<compile_context>
chip_gen: v7x
topology: tpu7x:2x2x1
jax: 0.10.0
libtpu: 0.0.40
codegen_flags: <defaults>
</compile_context>

<pallas_src>
import functools

import jax
import jax.numpy as jnp
import numpy as np
from jax.experimental import pallas as pl
from jax.experimental.pallas import tpu as pltpu


# ------------------------------ Pallas kernel -------------------------------

def _lenet_kernel(x_ref, wb1_ref, b1_ref, pw1_ref, ph1_ref,
                  wb2_ref, b2_ref, pw2_ref, ph2_ref,
                  wf1_ref, bf1_ref, wf2_ref, bf2_ref, wf3_ref, bf3_ref,
                  o_ref, *, ips):
    """Entire LeNet forward for `ips` images (statically unrolled).

    Note: if the last grid step holds fewer than `ips` valid images, the extra
    image slots contain garbage; they are processed independently and their
    output rows are masked on store by Pallas — do not remove the blocked
    output spec thinking the compute is wasted-but-wrong.
    """
    f32 = jnp.float32
    for b in range(ips):
        img = x_ref[b]                                        # (32, 32) padded image

        # conv1 (5x5, pad 2) + bias + sigmoid -> (28, 28*6), lanes = ow*6 + c.
        a1 = jnp.dot(img[0:28, :], wb1_ref[0], preferred_element_type=f32)
        for ki in range(1, 5):
            a1 += jnp.dot(img[ki:ki + 28, :], wb1_ref[ki],
                          preferred_element_type=f32)
        s1 = jax.nn.sigmoid(a1 + b1_ref[...])

        # 2x2 avg-pool as two matmuls (0.5 * 0.5 = 0.25): -> (14, 14*6).
        h1 = jnp.dot(ph1_ref[...],
                     jnp.dot(s1, pw1_ref[...], preferred_element_type=f32),
                     preferred_element_type=f32)

        # conv2 (5x5, valid) + bias + sigmoid -> (10, 10*16), lanes = ow*16 + c.
        a2 = jnp.dot(h1[0:10, :], wb2_ref[0], preferred_element_type=f32)
        for ki in range(1, 5):
            a2 += jnp.dot(h1[ki:ki + 10, :], wb2_ref[ki],
                          preferred_element_type=f32)
        s2 = jax.nn.sigmoid(a2 + b2_ref[...])

        # 2x2 avg-pool -> (5, 5*16).
        h2 = jnp.dot(ph2_ref[...],
                     jnp.dot(s2, pw2_ref[...], preferred_element_type=f32),
                     preferred_element_type=f32)

        # fc1 (400 -> 120): contract the 5 pooled rows against per-row weight
        # slabs (column permutation to PyTorch's (c,h,w) flatten order was done
        # once in prepare_pallas_params).
        af = jnp.dot(h2[0:1, :], wf1_ref[0], preferred_element_type=f32)
        for r in range(1, 5):
            af += jnp.dot(h2[r:r + 1, :], wf1_ref[r], preferred_element_type=f32)
        y = jax.nn.sigmoid(af + bf1_ref[...])                 # (1, 120)

        # fc2 + sigmoid, fc3, softmax (max-shift is mathematically identical to
        # the module's exp/sum softmax, just safe for large logits).
        y = jax.nn.sigmoid(jnp.dot(y, wf2_ref[...], preferred_element_type=f32)
                           + bf2_ref[...])                    # (1, 84)
        z = jnp.dot(y, wf3_ref[...], preferred_element_type=f32) + bf3_ref[...]
        z = z - jnp.max(z, axis=1, keepdims=True)
        e = jnp.exp(z)
        o_ref[b] = (e / jnp.sum(e, axis=1, keepdims=True)).astype(o_ref.dtype)


# ------------------------------ Pallas wrapper -------------------------------

def _images_per_step(batch):
    if batch >= 16:
        return 8                       # amortize per-grid-step overhead
    if batch >= 2:
        return max(1, batch // 2)      # keep >= 2 grid steps for the 2nd v7x TC
    return 1


def lenet_forward(pp, x):
    """x: (B, 1, 28, 28) NCHW float32 -> (B, 10) softmax probabilities."""
    B = x.shape[0]
    assert x.shape[1:] == (1, 28, 28)
    # Pad once in XLA (tiny: ~4 KB/image); everything else happens in-kernel.
    x_pad = jnp.pad(x.reshape(B, 28, 28), ((0, 0), (2, 2), (2, 2)))

    ips = _images_per_step(B)
    grid = (pl.cdiv(B, ips),)

    def resident(shape):
        # Full-block operand with a constant index_map: DMA'd once, then kept
        # resident in VMEM for every grid step.
        return pl.BlockSpec(shape, lambda *_, _n=len(shape): (0,) * _n)

    out = pl.pallas_call(
        functools.partial(_lenet_kernel, ips=ips),
        out_shape=jax.ShapeDtypeStruct((B, 1, 10), jnp.float32),
        grid=grid,
        in_specs=[
            pl.BlockSpec((ips, 32, 32), lambda i: (i, 0, 0)),
            resident(pp["wb1"].shape), resident(pp["b1"].shape),
            resident(pp["pw1"].shape), resident(pp["ph1"].shape),
            resident(pp["wb2"].shape), resident(pp["b2"].shape),
            resident(pp["pw2"].shape), resident(pp["ph2"].shape),
            resident(pp["wf1"].shape), resident(pp["bf1"].shape),
            resident(pp["wf2"].shape), resident(pp["bf2"].shape),
            resident(pp["wf3"].shape), resident(pp["bf3"].shape),
        ],
        out_specs=pl.BlockSpec((ips, 1, 10), lambda i: (i, 0, 0)),
        compiler_params=pltpu.CompilerParams(
            dimension_semantics=("parallel",),
            vmem_limit_bytes=32 * 1024 * 1024,
        ),
    )(x_pad, pp["wb1"], pp["b1"], pp["pw1"], pp["ph1"],
      pp["wb2"], pp["b2"], pp["pw2"], pp["ph2"],
      pp["wf1"], pp["bf1"], pp["wf2"], pp["bf2"], pp["wf3"], pp["bf3"])
    return out.reshape(B, 10)


# --------------------------------- params ------------------------------------

def init_lenet_params(key):
    """Deterministic PyTorch-style uniform(-1/sqrt(fan_in), +1/sqrt(fan_in)),
    stored in PyTorch layout (conv: OIHW, linear: (out, in))."""
    def uni(k, shape, fan_in):
        bound = 1.0 / np.sqrt(fan_in)
        return jax.random.uniform(k, shape, jnp.float32, -bound, bound)

    ks = jax.random.split(key, 10)
    return {
        "conv1_w": uni(ks[0], (6, 1, 5, 5), 1 * 5 * 5),
        "conv1_b": uni(ks[1], (6,), 1 * 5 * 5),
        "conv2_w": uni(ks[2], (16, 6, 5, 5), 6 * 5 * 5),
        "conv2_b": uni(ks[3], (16,), 6 * 5 * 5),
        "fc1_w": uni(ks[4], (120, 400), 400),
        "fc1_b": uni(ks[5], (120,), 400),
        "fc2_w": uni(ks[6], (84, 120), 120),
        "fc2_b": uni(ks[7], (84,), 120),
        "fc3_w": uni(ks[8], (10, 84), 84),
        "fc3_b": uni(ks[9], (10,), 84),
    }


def prepare_pallas_params(p):
    """One-time re-layout of PyTorch-convention params into kernel-ready shapes.

    conv weights become per-kernel-row "banded" matrices mapping padded-width
    lanes -> (out_width * out_channel) lanes; pools become 0.5-valued matmul
    matrices; fc1's columns are permuted once to consume our (h, w-packed-with-c)
    layout while matching PyTorch's (c, h, w) flatten order exactly.
    """
    w1 = np.asarray(p["conv1_w"], np.float32)   # (6, 1, 5, 5)
    b1 = np.asarray(p["conv1_b"], np.float32)
    w2 = np.asarray(p["conv2_w"], np.float32)   # (16, 6, 5, 5)
    b2 = np.asarray(p["conv2_b"], np.float32)
    f1 = np.asarray(p["fc1_w"], np.float32)     # (120, 400), cols = c*25 + h*5 + w
    f1b = np.asarray(p["fc1_b"], np.float32)
    f2 = np.asarray(p["fc2_w"], np.float32)     # (84, 120)
    f2b = np.asarray(p["fc2_b"], np.float32)
    f3 = np.asarray(p["fc3_w"], np.float32)     # (10, 84)
    f3b = np.asarray(p["fc3_b"], np.float32)

    # conv1: padded width (32 lanes) -> 28*6 lanes, one band matrix per kernel row.
    wb1 = np.zeros((5, 32, 28 * 6), np.float32)
    for ki in range(5):
        for kj in range(5):
            for ow in range(28):
                wb1[ki, ow + kj, ow * 6:(ow + 1) * 6] = w1[:, 0, ki, kj]
    b1row = np.tile(b1, 28).reshape(1, 28 * 6)

    pw1 = np.zeros((28 * 6, 14 * 6), np.float32)          # width 2:1 pool (x0.5)
    for ow in range(28):
        for c in range(6):
            pw1[ow * 6 + c, (ow // 2) * 6 + c] = 0.5
    ph1 = np.zeros((14, 28), np.float32)                   # height 2:1 pool (x0.5)
    for oh in range(28):
        ph1[oh // 2, oh] = 0.5

    # conv2: lanes (w*6 + cin) -> (ow*16 + cout), per kernel row.
    wb2 = np.zeros((5, 14 * 6, 10 * 16), np.float32)
    for ki in range(5):
        for kj in range(5):
            for ow in range(10):
                wb2[ki, (ow + kj) * 6:(ow + kj) * 6 + 6,
                    ow * 16:(ow + 1) * 16] = w2[:, :, ki, kj].T   # (ci, co)
    b2row = np.tile(b2, 10).reshape(1, 10 * 16)

    pw2 = np.zeros((10 * 16, 5 * 16), np.float32)
    for ow in range(10):
        for c in range(16):
            pw2[ow * 16 + c, (ow // 2) * 16 + c] = 0.5
    ph2 = np.zeros((5, 10), np.float32)
    for oh in range(10):
        ph2[oh // 2, oh] = 0.5

    # fc1, one (80, 120) slab per pooled row h; lane (w*16 + co) maps to
    # PyTorch flatten column co*25 + h*5 + w.
    wf1 = np.zeros((5, 5 * 16, 120), np.float32)
    for h in range(5):
        for w in range(5):
            for co in range(16):
                wf1[h, w * 16 + co, :] = f1[:, co * 25 + h * 5 + w]

    return {
        "wb1": jnp.asarray(wb1), "b1": jnp.asarray(b1row),
        "pw1": jnp.asarray(pw1), "ph1": jnp.asarray(ph1),
        "wb2": jnp.asarray(wb2), "b2": jnp.asarray(b2row),
        "pw2": jnp.asarray(pw2), "ph2": jnp.asarray(ph2),
        "wf1": jnp.asarray(wf1), "bf1": jnp.asarray(f1b.reshape(1, 120)),
        "wf2": jnp.asarray(f2.T), "bf2": jnp.asarray(f2b.reshape(1, 84)),
        "wf3": jnp.asarray(f3.T), "bf3": jnp.asarray(f3b.reshape(1, 10)),
    }


# ------------------------------ plain-JAX reference ---------------------------

def lenet_reference(p, x):
    """NCHW reference mirroring the PyTorch module exactly (for the check)."""
    hi = jax.lax.Precision.HIGHEST

    def conv(x, w, b, pad):
        y = jax.lax.conv_general_dilated(
            x, w, window_strides=(1, 1), padding=((pad, pad), (pad, pad)),
            dimension_numbers=("NCHW", "OIHW", "NCHW"), precision=hi)
        return y + b.reshape(1, -1, 1, 1)

    def avgpool2(x):
        B, C, H, W = x.shape
        return x.reshape(B, C, H // 2, 2, W // 2, 2).mean(axis=(3, 5))

    x = avgpool2(jax.nn.sigmoid(conv(x, p["conv1_w"], p["conv1_b"], 2)))
    x = avgpool2(jax.nn.sigmoid(conv(x, p["conv2_w"], p["conv2_b"], 0)))
    x = x.reshape(x.shape[0], -1)
    x = jax.nn.sigmoid(jnp.dot(x, p["fc1_w"].T, precision=hi) + p["fc1_b"])
    x = jax.nn.sigmoid(jnp.dot(x, p["fc2_w"].T, precision=hi) + p["fc2_b"])
    x = jnp.dot(x, p["fc3_w"].T, precision=hi) + p["fc3_b"]
    e = jnp.exp(x)
    return e / jnp.sum(e, axis=1, keepdims=True)


if __name__ == "__main__":
    key = jax.random.PRNGKey(0)
    k_param, k_x = jax.random.split(key)
    params = init_lenet_params(k_param)
    pallas_params = prepare_pallas_params(params)     # one-time weight re-layout
    # LeNet's fc1 (16*5*5) pins the spatial size to 28x28; use batch=2.
    x = jax.random.normal(k_x, (2, 1, 28, 28), dtype=jnp.float32)

    out = jax.block_until_ready(jax.jit(lenet_forward)(pallas_params, x))
    ref = jax.block_until_ready(jax.jit(lenet_reference)(params, x))

    assert out.shape == (2, 10)
    assert np.allclose(np.asarray(out).sum(axis=1), 1.0, atol=1e-5)
    # Kernel matmuls run at the MXU default precision; reference uses HIGHEST,
    # so allow a little headroom (per review: relax the previously tight 1e-4).
    assert np.allclose(np.asarray(out), np.asarray(ref), atol=2e-4, rtol=2e-4)
    print("KERNEL_OK")
</pallas_src>

<mosaic_0001>
module attributes {stable_mosaic.version = 11 : i64} {
  func.func @_lenet_kernel(%arg0: i32, %arg1: memref<1x32x32xf32, #tpu.memory_space<vmem>>, %arg2: memref<5x32x168xf32, #tpu.memory_space<vmem>>, %arg3: memref<1x168xf32, #tpu.memory_space<vmem>>, %arg4: memref<168x84xf32, #tpu.memory_space<vmem>>, %arg5: memref<14x28xf32, #tpu.memory_space<vmem>>, %arg6: memref<5x84x160xf32, #tpu.memory_space<vmem>>, %arg7: memref<1x160xf32, #tpu.memory_space<vmem>>, %arg8: memref<160x80xf32, #tpu.memory_space<vmem>>, %arg9: memref<5x10xf32, #tpu.memory_space<vmem>>, %arg10: memref<5x80x120xf32, #tpu.memory_space<vmem>>, %arg11: memref<1x120xf32, #tpu.memory_space<vmem>>, %arg12: memref<120x84xf32, #tpu.memory_space<vmem>>, %arg13: memref<1x84xf32, #tpu.memory_space<vmem>>, %arg14: memref<84x10xf32, #tpu.memory_space<vmem>>, %arg15: memref<1x10xf32, #tpu.memory_space<vmem>>, %arg16: memref<1x1x10xf32, #tpu.memory_space<vmem>>) attributes {dimension_semantics = [#tpu.dimension_semantics<parallel>], iteration_bounds = array<i64: 2>, scalar_prefetch = 0 : i64, scratch_operands = 0 : i64, tpu.core_type = #tpu.core_type<tc>, window_params = [{transform_indices = @transform_0, window_bounds = array<i64: 1, 32, 32>}, {pipeline_mode = #tpu.pipeline_mode<synchronous>, transform_indices = @transform_1, window_bounds = array<i64: 5, 32, 168>}, {pipeline_mode = #tpu.pipeline_mode<synchronous>, transform_indices = @transform_2, window_bounds = array<i64: 1, 168>}, {pipeline_mode = #tpu.pipeline_mode<synchronous>, transform_indices = @transform_3, window_bounds = array<i64: 168, 84>}, {pipeline_mode = #tpu.pipeline_mode<synchronous>, transform_indices = @transform_4, window_bounds = array<i64: 14, 28>}, {pipeline_mode = #tpu.pipeline_mode<synchronous>, transform_indices = @transform_5, window_bounds = array<i64: 5, 84, 160>}, {pipeline_mode = #tpu.pipeline_mode<synchronous>, transform_indices = @transform_6, window_bounds = array<i64: 1, 160>}, {pipeline_mode = #tpu.pipeline_mode<synchronous>, transform_indices = @transform_7, window_bounds = array<i64: 160, 80>}, {pipeline_mode = #tpu.pipeline_mode<synchronous>, transform_indices = @transform_8, window_bounds = array<i64: 5, 10>}, {pipeline_mode = #tpu.pipeline_mode<synchronous>, transform_indices = @transform_9, window_bounds = array<i64: 5, 80, 120>}, {pipeline_mode = #tpu.pipeline_mode<synchronous>, transform_indices = @transform_10, window_bounds = array<i64: 1, 120>}, {pipeline_mode = #tpu.pipeline_mode<synchronous>, transform_indices = @transform_11, window_bounds = array<i64: 120, 84>}, {pipeline_mode = #tpu.pipeline_mode<synchronous>, transform_indices = @transform_12, window_bounds = array<i64: 1, 84>}, {pipeline_mode = #tpu.pipeline_mode<synchronous>, transform_indices = @transform_13, window_bounds = array<i64: 84, 10>}, {pipeline_mode = #tpu.pipeline_mode<synchronous>, transform_indices = @transform_14, window_bounds = array<i64: 1, 10>}, {transform_indices = @transform_15, window_bounds = array<i64: 1, 1, 10>}]} {
    %c0 = arith.constant 0 : index
    %c0_0 = arith.constant 0 : index
    %c0_1 = arith.constant 0 : index
    %0 = vector.load %arg1[%c0, %c0_0, %c0_1] : memref<1x32x32xf32, #tpu.memory_space<vmem>>, vector<1x32x32xf32>
    %1 = vector.shape_cast %0 : vector<1x32x32xf32> to vector<32x32xf32>
    %2 = vector.extract_strided_slice %1 {offsets = [0, 0], sizes = [28, 32], strides = [1, 1]} : vector<32x32xf32> to vector<28x32xf32>
    %c0_2 = arith.constant 0 : index
    %c0_3 = arith.constant 0 : index
    %c0_4 = arith.constant 0 : index
    %3 = vector.load %arg2[%c0_2, %c0_3, %c0_4] : memref<5x32x168xf32, #tpu.memory_space<vmem>>, vector<1x32x168xf32>
    %4 = vector.shape_cast %3 : vector<1x32x168xf32> to vector<32x168xf32>
    %cst = arith.constant dense<0.000000e+00> : vector<28x168xf32>
    %5 = tpu.matmul %2, %4, %cst {dimension_numbers = #tpu.dot_dimension_numbers<[1], [0], [0], [1], [0, 0, 1, 1], [], []>} : vector<28x32xf32>, vector<32x168xf32>, vector<28x168xf32> -> vector<28x168xf32>
    %6 = vector.extract_strided_slice %1 {offsets = [1, 0], sizes = [28, 32], strides = [1, 1]} : vector<32x32xf32> to vector<28x32xf32>
    %c1 = arith.constant 1 : index
    %c0_5 = arith.constant 0 : index
    %c0_6 = arith.constant 0 : index
    %7 = vector.load %arg2[%c1, %c0_5, %c0_6] : memref<5x32x168xf32, #tpu.memory_space<vmem>>, vector<1x32x168xf32>
    %8 = vector.shape_cast %7 : vector<1x32x168xf32> to vector<32x168xf32>
    %cst_7 = arith.constant dense<0.000000e+00> : vector<28x168xf32>
    %9 = tpu.matmul %6, %8, %cst_7 {dimension_numbers = #tpu.dot_dimension_numbers<[1], [0], [0], [1], [0, 0, 1, 1], [], []>} : vector<28x32xf32>, vector<32x168xf32>, vector<28x168xf32> -> vector<28x168xf32>
    %10 = arith.addf %5, %9 : vector<28x168xf32>
    %11 = vector.extract_strided_slice %1 {offsets = [2, 0], sizes = [28, 32], strides = [1, 1]} : vector<32x32xf32> to vector<28x32xf32>
    %c2 = arith.constant 2 : index
    %c0_8 = arith.constant 0 : index
    %c0_9 = arith.constant 0 : index
    %12 = vector.load %arg2[%c2, %c0_8, %c0_9] : memref<5x32x168xf32, #tpu.memory_space<vmem>>, vector<1x32x168xf32>
    %13 = vector.shape_cast %12 : vector<1x32x168xf32> to vector<32x168xf32>
    %cst_10 = arith.constant dense<0.000000e+00> : vector<28x168xf32>
    %14 = tpu.matmul %11, %13, %cst_10 {dimension_numbers = #tpu.dot_dimension_numbers<[1], [0], [0], [1], [0, 0, 1, 1], [], []>} : vector<28x32xf32>, vector<32x168xf32>, vector<28x168xf32> -> vector<28x168xf32>
    %15 = arith.addf %10, %14 : vector<28x168xf32>
    %16 = vector.extract_strided_slice %1 {offsets = [3, 0], sizes = [28, 32], strides = [1, 1]} : vector<32x32xf32> to vector<28x32xf32>
    %c3 = arith.constant 3 : index
    %c0_11 = arith.constant 0 : index
    %c0_12 = arith.constant 0 : index
    %17 = vector.load %arg2[%c3, %c0_11, %c0_12] : memref<5x32x168xf32, #tpu.memory_space<vmem>>, vector<1x32x168xf32>
    %18 = vector.shape_cast %17 : vector<1x32x168xf32> to vector<32x168xf32>
    %cst_13 = arith.constant dense<0.000000e+00> : vector<28x168xf32>
    %19 = tpu.matmul %16, %18, %cst_13 {dimension_numbers = #tpu.dot_dimension_numbers<[1], [0], [0], [1], [0, 0, 1, 1], [], []>} : vector<28x32xf32>, vector<32x168xf32>, vector<28x168xf32> -> vector<28x168xf32>
    %20 = arith.addf %15, %19 : vector<28x168xf32>
    %21 = vector.extract_strided_slice %1 {offsets = [4, 0], sizes = [28, 32], strides = [1, 1]} : vector<32x32xf32> to vector<28x32xf32>
    %c4 = arith.constant 4 : index
    %c0_14 = arith.constant 0 : index
    %c0_15 = arith.constant 0 : index
    %22 = vector.load %arg2[%c4, %c0_14, %c0_15] : memref<5x32x168xf32, #tpu.memory_space<vmem>>, vector<1x32x168xf32>
    %23 = vector.shape_cast %22 : vector<1x32x168xf32> to vector<32x168xf32>
    %cst_16 = arith.constant dense<0.000000e+00> : vector<28x168xf32>
    %24 = tpu.matmul %21, %23, %cst_16 {dimension_numbers = #tpu.dot_dimension_numbers<[1], [0], [0], [1], [0, 0, 1, 1], [], []>} : vector<28x32xf32>, vector<32x168xf32>, vector<28x168xf32> -> vector<28x168xf32>
    %25 = arith.addf %20, %24 : vector<28x168xf32>
    %c0_17 = arith.constant 0 : index
    %c0_18 = arith.constant 0 : index
    %26 = vector.load %arg3[%c0_17, %c0_18] : memref<1x168xf32, #tpu.memory_space<vmem>>, vector<1x168xf32>
    %27 = vector.broadcast %26 : vector<1x168xf32> to vector<28x168xf32>
    %28 = arith.addf %25, %27 : vector<28x168xf32>
    %29 = arith.negf %28 : vector<28x168xf32>
    %30 = math.exp %29 : vector<28x168xf32>
    %cst_19 = arith.constant 1.000000e+00 : f32
    %31 = vector.broadcast %cst_19 : f32 to vector<28x168xf32>
    %32 = arith.addf %31, %30 : vector<28x168xf32>
    %33 = arith.divf %31, %32 : vector<28x168xf32>
    %c0_20 = arith.constant 0 : index
    %c0_21 = arith.constant 0 : index
    %34 = vector.load %arg5[%c0_20, %c0_21] : memref<14x28xf32, #tpu.memory_space<vmem>>, vector<14x28xf32>
    %c0_22 = arith.constant 0 : index
    %c0_23 = arith.constant 0 : index
    %35 = vector.load %arg4[%c0_22, %c0_23] : memref<168x84xf32, #tpu.memory_space<vmem>>, vector<168x84xf32>
    %cst_24 = arith.constant dense<0.000000e+00> : vector<28x84xf32>
    %36 = tpu.matmul %33, %35, %cst_24 {dimension_numbers = #tpu.dot_dimension_numbers<[1], [0], [0], [1], [0, 0, 1, 1], [], []>} : vector<28x168xf32>, vector<168x84xf32>, vector<28x84xf32> -> vector<28x84xf32>
    %cst_25 = arith.constant dense<0.000000e+00> : vector<14x84xf32>
    %37 = tpu.matmul %34, %36, %cst_25 {dimension_numbers = #tpu.dot_dimension_numbers<[1], [0], [0], [1], [0, 0, 1, 1], [], []>} : vector<14x28xf32>, vector<28x84xf32>, vector<14x84xf32> -> vector<14x84xf32>
    %38 = vector.extract_strided_slice %37 {offsets = [0, 0], sizes = [10, 84], strides = [1, 1]} : vector<14x84xf32> to vector<10x84xf32>
    %c0_26 = arith.constant 0 : index
    %c0_27 = arith.constant 0 : index
    %c0_28 = arith.constant 0 : index
    %39 = vector.load %arg6[%c0_26, %c0_27, %c0_28] : memref<5x84x160xf32, #tpu.memory_space<vmem>>, vector<1x84x160xf32>
    %40 = vector.shape_cast %39 : vector<1x84x160xf32> to vector<84x160xf32>
    %cst_29 = arith.constant dense<0.000000e+00> : vector<10x160xf32>
    %41 = tpu.matmul %38, %40, %cst_29 {dimension_numbers = #tpu.dot_dimension_numbers<[1], [0], [0], [1], [0, 0, 1, 1], [], []>} : vector<10x84xf32>, vector<84x160xf32>, vector<10x160xf32> -> vector<10x160xf32>
    %42 = vector.extract_strided_slice %37 {offsets = [1, 0], sizes = [10, 84], strides = [1, 1]} : vector<14x84xf32> to vector<10x84xf32>
    %c1_30 = arith.constant 1 : index
    %c0_31 = arith.constant 0 : index
    %c0_32 = arith.constant 0 : index
    %43 = vector.load %arg6[%c1_30, %c0_31, %c0_32] : memref<5x84x160xf32, #tpu.memory_space<vmem>>, vector<1x84x160xf32>
    %44 = vector.shape_cast %43 : vector<1x84x160xf32> to vector<84x160xf32>
    %cst_33 = arith.constant dense<0.000000e+00> : vector<10x160xf32>
    %45 = tpu.matmul %42, %44, %cst_33 {dimension_numbers = #tpu.dot_dimension_numbers<[1], [0], [0], [1], [0, 0, 1, 1], [], []>} : vector<10x84xf32>, vector<84x160xf32>, vector<10x160xf32> -> vector<10x160xf32>
    %46 = arith.addf %41, %45 : vector<10x160xf32>
    %47 = vector.extract_strided_slice %37 {offsets = [2, 0], sizes = [10, 84], strides = [1, 1]} : vector<14x84xf32> to vector<10x84xf32>
    %c2_34 = arith.constant 2 : index
    %c0_35 = arith.constant 0 : index
    %c0_36 = arith.constant 0 : index
    %48 = vector.load %arg6[%c2_34, %c0_35, %c0_36] : memref<5x84x160xf32, #tpu.memory_space<vmem>>, vector<1x84x160xf32>
    %49 = vector.shape_cast %48 : vector<1x84x160xf32> to vector<84x160xf32>
    %cst_37 = arith.constant dense<0.000000e+00> : vector<10x160xf32>
    %50 = tpu.matmul %47, %49, %cst_37 {dimension_numbers = #tpu.dot_dimension_numbers<[1], [0], [0], [1], [0, 0, 1, 1], [], []>} : vector<10x84xf32>, vector<84x160xf32>, vector<10x160xf32> -> vector<10x160xf32>
    %51 = arith.addf %46, %50 : vector<10x160xf32>
    %52 = vector.extract_strided_slice %37 {offsets = [3, 0], sizes = [10, 84], strides = [1, 1]} : vector<14x84xf32> to vector<10x84xf32>
    %c3_38 = arith.constant 3 : index
    %c0_39 = arith.constant 0 : index
    %c0_40 = arith.constant 0 : index
    %53 = vector.load %arg6[%c3_38, %c0_39, %c0_40] : memref<5x84x160xf32, #tpu.memory_space<vmem>>, vector<1x84x160xf32>
    %54 = vector.shape_cast %53 : vector<1x84x160xf32> to vector<84x160xf32>
    %cst_41 = arith.constant dense<0.000000e+00> : vector<10x160xf32>
    %55 = tpu.matmul %52, %54, %cst_41 {dimension_numbers = #tpu.dot_dimension_numbers<[1], [0], [0], [1], [0, 0, 1, 1], [], []>} : vector<10x84xf32>, vector<84x160xf32>, vector<10x160xf32> -> vector<10x160xf32>
    %56 = arith.addf %51, %55 : vector<10x160xf32>
    %57 = vector.extract_strided_slice %37 {offsets = [4, 0], sizes = [10, 84], strides = [1, 1]} : vector<14x84xf32> to vector<10x84xf32>
    %c4_42 = arith.constant 4 : index
    %c0_43 = arith.constant 0 : index
    %c0_44 = arith.constant 0 : index
    %58 = vector.load %arg6[%c4_42, %c0_43, %c0_44] : memref<5x84x160xf32, #tpu.memory_space<vmem>>, vector<1x84x160xf32>
    %59 = vector.shape_cast %58 : vector<1x84x160xf32> to vector<84x160xf32>
    %cst_45 = arith.constant dense<0.000000e+00> : vector<10x160xf32>
    %60 = tpu.matmul %57, %59, %cst_45 {dimension_numbers = #tpu.dot_dimension_numbers<[1], [0], [0], [1], [0, 0, 1, 1], [], []>} : vector<10x84xf32>, vector<84x160xf32>, vector<10x160xf32> -> vector<10x160xf32>
    %61 = arith.addf %56, %60 : vector<10x160xf32>
    %c0_46 = arith.constant 0 : index
    %c0_47 = arith.constant 0 : index
    %62 = vector.load %arg7[%c0_46, %c0_47] : memref<1x160xf32, #tpu.memory_space<vmem>>, vector<1x160xf32>
    %63 = vector.broadcast %62 : vector<1x160xf32> to vector<10x160xf32>
    %64 = arith.addf %61, %63 : vector<10x160xf32>
    %65 = arith.negf %64 : vector<10x160xf32>
    %66 = math.exp %65 : vector<10x160xf32>
    %cst_48 = arith.constant 1.000000e+00 : f32
    %67 = vector.broadcast %cst_48 : f32 to vector<10x160xf32>
    %68 = arith.addf %67, %66 : vector<10x160xf32>
    %69 = arith.divf %67, %68 : vector<10x160xf32>
    %c0_49 = arith.constant 0 : index
    %c0_50 = arith.constant 0 : index
    %70 = vector.load %arg9[%c0_49, %c0_50] : memref<5x10xf32, #tpu.memory_space<vmem>>, vector<5x10xf32>
    %c0_51 = arith.constant 0 : index
    %c0_52 = arith.constant 0 : index
    %71 = vector.load %arg8[%c0_51, %c0_52] : memref<160x80xf32, #tpu.memory_space<vmem>>, vector<160x80xf32>
    %cst_53 = arith.constant dense<0.000000e+00> : vector<10x80xf32>
    %72 = tpu.matmul %69, %71, %cst_53 {dimension_numbers = #tpu.dot_dimension_numbers<[1], [0], [0], [1], [0, 0, 1, 1], [], []>} : vector<10x160xf32>, vector<160x80xf32>, vector<10x80xf32> -> vector<10x80xf32>
    %cst_54 = arith.constant dense<0.000000e+00> : vector<5x80xf32>
    %73 = tpu.matmul %70, %72, %cst_54 {dimension_numbers = #tpu.dot_dimension_numbers<[1], [0], [0], [1], [0, 0, 1, 1], [], []>} : vector<5x10xf32>, vector<10x80xf32>, vector<5x80xf32> -> vector<5x80xf32>
    %74 = vector.extract_strided_slice %73 {offsets = [0, 0], sizes = [1, 80], strides = [1, 1]} : vector<5x80xf32> to vector<1x80xf32>
    %c0_55 = arith.constant 0 : index
    %c0_56 = arith.constant 0 : index
    %c0_57 = arith.constant 0 : index
    %75 = vector.load %arg10[%c0_55, %c0_56, %c0_57] : memref<5x80x120xf32, #tpu.memory_space<vmem>>, vector<1x80x120xf32>
    %76 = vector.shape_cast %75 : vector<1x80x120xf32> to vector<80x120xf32>
    %cst_58 = arith.constant dense<0.000000e+00> : vector<1x120xf32>
    %77 = tpu.matmul %74, %76, %cst_58 {dimension_numbers = #tpu.dot_dimension_numbers<[1], [0], [0], [1], [0, 0, 1, 1], [], []>} : vector<1x80xf32>, vector<80x120xf32>, vector<1x120xf32> -> vector<1x120xf32>
    %78 = vector.extract_strided_slice %73 {offsets = [1, 0], sizes = [1, 80], strides = [1, 1]} : vector<5x80xf32> to vector<1x80xf32>
    %c1_59 = arith.constant 1 : index
    %c0_60 = arith.constant 0 : index
    %c0_61 = arith.constant 0 : index
    %79 = vector.load %arg10[%c1_59, %c0_60, %c0_61] : memref<5x80x120xf32, #tpu.memory_space<vmem>>, vector<1x80x120xf32>
    %80 = vector.shape_cast %79 : vector<1x80x120xf32> to vector<80x120xf32>
    %cst_62 = arith.constant dense<0.000000e+00> : vector<1x120xf32>
    %81 = tpu.matmul %78, %80, %cst_62 {dimension_numbers = #tpu.dot_dimension_numbers<[1], [0], [0], [1], [0, 0, 1, 1], [], []>} : vector<1x80xf32>, vector<80x120xf32>, vector<1x120xf32> -> vector<1x120xf32>
    %82 = arith.addf %77, %81 : vector<1x120xf32>
    %83 = vector.extract_strided_slice %73 {offsets = [2, 0], sizes = [1, 80], strides = [1, 1]} : vector<5x80xf32> to vector<1x80xf32>
    %c2_63 = arith.constant 2 : index
    %c0_64 = arith.constant 0 : index
    %c0_65 = arith.constant 0 : index
    %84 = vector.load %arg10[%c2_63, %c0_64, %c0_65] : memref<5x80x120xf32, #tpu.memory_space<vmem>>, vector<1x80x120xf32>
    %85 = vector.shape_cast %84 : vector<1x80x120xf32> to vector<80x120xf32>
    %cst_66 = arith.constant dense<0.000000e+00> : vector<1x120xf32>
    %86 = tpu.matmul %83, %85, %cst_66 {dimension_numbers = #tpu.dot_dimension_numbers<[1], [0], [0], [1], [0, 0, 1, 1], [], []>} : vector<1x80xf32>, vector<80x120xf32>, vector<1x120xf32> -> vector<1x120xf32>
    %87 = arith.addf %82, %86 : vector<1x120xf32>
    %88 = vector.extract_strided_slice %73 {offsets = [3, 0], sizes = [1, 80], strides = [1, 1]} : vector<5x80xf32> to vector<1x80xf32>
    %c3_67 = arith.constant 3 : index
    %c0_68 = arith.constant 0 : index
    %c0_69 = arith.constant 0 : index
    %89 = vector.load %arg10[%c3_67, %c0_68, %c0_69] : memref<5x80x120xf32, #tpu.memory_space<vmem>>, vector<1x80x120xf32>
    %90 = vector.shape_cast %89 : vector<1x80x120xf32> to vector<80x120xf32>
    %cst_70 = arith.constant dense<0.000000e+00> : vector<1x120xf32>
    %91 = tpu.matmul %88, %90, %cst_70 {dimension_numbers = #tpu.dot_dimension_numbers<[1], [0], [0], [1], [0, 0, 1, 1], [], []>} : vector<1x80xf32>, vector<80x120xf32>, vector<1x120xf32> -> vector<1x120xf32>
    %92 = arith.addf %87, %91 : vector<1x120xf32>
    %93 = vector.extract_strided_slice %73 {offsets = [4, 0], sizes = [1, 80], strides = [1, 1]} : vector<5x80xf32> to vector<1x80xf32>
    %c4_71 = arith.constant 4 : index
    %c0_72 = arith.constant 0 : index
    %c0_73 = arith.constant 0 : index
    %94 = vector.load %arg10[%c4_71, %c0_72, %c0_73] : memref<5x80x120xf32, #tpu.memory_space<vmem>>, vector<1x80x120xf32>
    %95 = vector.shape_cast %94 : vector<1x80x120xf32> to vector<80x120xf32>
    %cst_74 = arith.constant dense<0.000000e+00> : vector<1x120xf32>
    %96 = tpu.matmul %93, %95, %cst_74 {dimension_numbers = #tpu.dot_dimension_numbers<[1], [0], [0], [1], [0, 0, 1, 1], [], []>} : vector<1x80xf32>, vector<80x120xf32>, vector<1x120xf32> -> vector<1x120xf32>
    %97 = arith.addf %92, %96 : vector<1x120xf32>
    %c0_75 = arith.constant 0 : index
    %c0_76 = arith.constant 0 : index
    %98 = vector.load %arg11[%c0_75, %c0_76] : memref<1x120xf32, #tpu.memory_space<vmem>>, vector<1x120xf32>
    %99 = arith.addf %97, %98 : vector<1x120xf32>
    %100 = arith.negf %99 : vector<1x120xf32>
    %101 = math.exp %100 : vector<1x120xf32>
    %cst_77 = arith.constant 1.000000e+00 : f32
    %102 = vector.broadcast %cst_77 : f32 to vector<1x120xf32>
    %103 = arith.addf %102, %101 : vector<1x120xf32>
    %104 = arith.divf %102, %103 : vector<1x120xf32>
    %c0_78 = arith.constant 0 : index
    %c0_79 = arith.constant 0 : index
    %105 = vector.load %arg12[%c0_78, %c0_79] : memref<120x84xf32, #tpu.memory_space<vmem>>, vector<120x84xf32>
    %cst_80 = arith.constant dense<0.000000e+00> : vector<1x84xf32>
    %106 = tpu.matmul %104, %105, %cst_80 {dimension_numbers = #tpu.dot_dimension_numbers<[1], [0], [0], [1], [0, 0, 1, 1], [], []>} : vector<1x120xf32>, vector<120x84xf32>, vector<1x84xf32> -> vector<1x84xf32>
    %c0_81 = arith.constant 0 : index
    %c0_82 = arith.constant 0 : index
    %107 = vector.load %arg13[%c0_81, %c0_82] : memref<1x84xf32, #tpu.memory_space<vmem>>, vector<1x84xf32>
    %108 = arith.addf %106, %107 : vector<1x84xf32>
    %109 = arith.negf %108 : vector<1x84xf32>
    %110 = math.exp %109 : vector<1x84xf32>
    %cst_83 = arith.constant 1.000000e+00 : f32
    %111 = vector.broadcast %cst_83 : f32 to vector<1x84xf32>
    %112 = arith.addf %111, %110 : vector<1x84xf32>
    %113 = arith.divf %111, %112 : vector<1x84xf32>
    %c0_84 = arith.constant 0 : index
    %c0_85 = arith.constant 0 : index
    %114 = vector.load %arg14[%c0_84, %c0_85] : memref<84x10xf32, #tpu.memory_space<vmem>>, vector<84x10xf32>
    %cst_86 = arith.constant dense<0.000000e+00> : vector<1x10xf32>
    %115 = tpu.matmul %113, %114, %cst_86 {dimension_numbers = #tpu.dot_dimension_numbers<[1], [0], [0], [1], [0, 0, 1, 1], [], []>} : vector<1x84xf32>, vector<84x10xf32>, vector<1x10xf32> -> vector<1x10xf32>
    %c0_87 = arith.constant 0 : index
    %c0_88 = arith.constant 0 : index
    %116 = vector.load %arg15[%c0_87, %c0_88] : memref<1x10xf32, #tpu.memory_space<vmem>>, vector<1x10xf32>
    %117 = arith.addf %115, %116 : vector<1x10xf32>
    %cst_89 = arith.constant dense<0xFF800000> : vector<1xf32>
    %118 = vector.multi_reduction <maximumf>, %117, %cst_89 [1] : vector<1x10xf32> to vector<1xf32>
    %119 = vector.shape_cast %118 : vector<1xf32> to vector<1x1xf32>
    %120 = vector.broadcast %119 : vector<1x1xf32> to vector<1x10xf32>
    %121 = arith.subf %117, %120 : vector<1x10xf32>
    %122 = math.exp %121 : vector<1x10xf32>
    %cst_90 = arith.constant dense<0.000000e+00> : vector<1xf32>
    %123 = vector.multi_reduction <add>, %122, %cst_90 [1] : vector<1x10xf32> to vector<1xf32>
    %124 = vector.shape_cast %123 : vector<1xf32> to vector<1x1xf32>
    %125 = vector.broadcast %124 : vector<1x1xf32> to vector<1x10xf32>
    %126 = arith.divf %122, %125 : vector<1x10xf32>
    %c0_91 = arith.constant 0 : index
    %c0_92 = arith.constant 0 : index
    %c0_93 = arith.constant 0 : index
    %127 = vector.load %arg16[%c0_91, %c0_92, %c0_93] : memref<1x1x10xf32, #tpu.memory_space<vmem>>, vector<1x1x10xf32>
    %128 = vector.shape_cast %127 : vector<1x1x10xf32> to vector<1x10xf32>
    %129 = vector.shape_cast %126 : vector<1x10xf32> to vector<1x1x10xf32>
    tpu.vector_store %arg16[%c0_91, %c0_92, %c0_93], %129 {strides = array<i32>} : memref<1x1x10xf32, #tpu.memory_space<vmem>>, vector<1x1x10xf32>,
    return
  }
  func.func @transform_0(%arg0: i32) -> (i32, i32, i32) {
    %c0_i32 = arith.constant 0 : i32
    %c0_i32_0 = arith.constant 0 : i32
    %c0_i32_1 = arith.constant 0 : i32
    return %arg0, %c0_i32, %c0_i32_0 : i32, i32, i32
  }
  func.func @transform_1(%arg0: i32) -> (i32, i32, i32) {
    %c0_i32 = arith.constant 0 : i32
    %c0_i32_0 = arith.constant 0 : i32
    %c0_i32_1 = arith.constant 0 : i32
    %c0_i32_2 = arith.constant 0 : i32
    return %c0_i32, %c0_i32_0, %c0_i32_1 : i32, i32, i32
  }
  func.func @transform_2(%arg0: i32) -> (i32, i32) {
    %c0_i32 = arith.constant 0 : i32
    %c0_i32_0 = arith.constant 0 : i32
    %c0_i32_1 = arith.constant 0 : i32
    return %c0_i32, %c0_i32_0 : i32, i32
  }
  func.func @transform_3(%arg0: i32) -> (i32, i32) {
    %c0_i32 = arith.constant 0 : i32
    %c0_i32_0 = arith.constant 0 : i32
    %c0_i32_1 = arith.constant 0 : i32
    return %c0_i32, %c0_i32_0 : i32, i32
  }
  func.func @transform_4(%arg0: i32) -> (i32, i32) {
    %c0_i32 = arith.constant 0 : i32
    %c0_i32_0 = arith.constant 0 : i32
    %c0_i32_1 = arith.constant 0 : i32
    return %c0_i32, %c0_i32_0 : i32, i32
  }
  func.func @transform_5(%arg0: i32) -> (i32, i32, i32) {
    %c0_i32 = arith.constant 0 : i32
    %c0_i32_0 = arith.constant 0 : i32
    %c0_i32_1 = arith.constant 0 : i32
    %c0_i32_2 = arith.constant 0 : i32
    return %c0_i32, %c0_i32_0, %c0_i32_1 : i32, i32, i32
  }
  func.func @transform_6(%arg0: i32) -> (i32, i32) {
    %c0_i32 = arith.constant 0 : i32
    %c0_i32_0 = arith.constant 0 : i32
    %c0_i32_1 = arith.constant 0 : i32
    return %c0_i32, %c0_i32_0 : i32, i32
  }
  func.func @transform_7(%arg0: i32) -> (i32, i32) {
    %c0_i32 = arith.constant 0 : i32
    %c0_i32_0 = arith.constant 0 : i32
    %c0_i32_1 = arith.constant 0 : i32
    return %c0_i32, %c0_i32_0 : i32, i32
  }
  func.func @transform_8(%arg0: i32) -> (i32, i32) {
    %c0_i32 = arith.constant 0 : i32
    %c0_i32_0 = arith.constant 0 : i32
    %c0_i32_1 = arith.constant 0 : i32
    return %c0_i32, %c0_i32_0 : i32, i32
  }
  func.func @transform_9(%arg0: i32) -> (i32, i32, i32) {
    %c0_i32 = arith.constant 0 : i32
    %c0_i32_0 = arith.constant 0 : i32
    %c0_i32_1 = arith.constant 0 : i32
    %c0_i32_2 = arith.constant 0 : i32
    return %c0_i32, %c0_i32_0, %c0_i32_1 : i32, i32, i32
  }
  func.func @transform_10(%arg0: i32) -> (i32, i32) {
    %c0_i32 = arith.constant 0 : i32
    %c0_i32_0 = arith.constant 0 : i32
    %c0_i32_1 = arith.constant 0 : i32
    return %c0_i32, %c0_i32_0 : i32, i32
  }
  func.func @transform_11(%arg0: i32) -> (i32, i32) {
    %c0_i32 = arith.constant 0 : i32
    %c0_i32_0 = arith.constant 0 : i32
    %c0_i32_1 = arith.constant 0 : i32
    return %c0_i32, %c0_i32_0 : i32, i32
  }
  func.func @transform_12(%arg0: i32) -> (i32, i32) {
    %c0_i32 = arith.constant 0 : i32
    %c0_i32_0 = arith.constant 0 : i32
    %c0_i32_1 = arith.constant 0 : i32
    return %c0_i32, %c0_i32_0 : i32, i32
  }
  func.func @transform_13(%arg0: i32) -> (i32, i32) {
    %c0_i32 = arith.constant 0 : i32
    %c0_i32_0 = arith.constant 0 : i32
    %c0_i32_1 = arith.constant 0 : i32
    return %c0_i32, %c0_i32_0 : i32, i32
  }
  func.func @transform_14(%arg0: i32) -> (i32, i32) {
    %c0_i32 = arith.constant 0 : i32
    %c0_i32_0 = arith.constant 0 : i32
    %c0_i32_1 = arith.constant 0 : i32
    return %c0_i32, %c0_i32_0 : i32, i32
  }
  func.func @transform_15(%arg0: i32) -> (i32, i32, i32) {
    %c0_i32 = arith.constant 0 : i32
    %c0_i32_0 = arith.constant 0 : i32
    %c0_i32_1 = arith.constant 0 : i32
    return %arg0, %c0_i32, %c0_i32_0 : i32, i32, i32
  }
}

</mosaic_0001>

<bundles_post_ra>
// kernel: lenet_forward.1
= control target key start
LH: loop header
LB: loop body
LE: loop exit
PB: predicated region body
PF: predicated region fallthrough
CT: control target
= control target key end

     0   :  { %20 = vsyncpa [#allocation3], 0  ;;  %s5200_s0 = inlined_call_operand.vmem [shape: f32[2,32,32], index: 0, kind: input, shape index: {}]   ;;  %s5201_s1 = inlined_call_operand.vmem [shape: f32[5,32,168], index: 1, kind: input, shape index: {}]   ;;  %s5202_s2 = inlined_call_operand.vmem [shape: f32[1,168], index: 2, kind: input, shape index: {}]   ;;  %s5203_s3 = inlined_call_operand.vmem [shape: f32[168,84], index: 3, kind: input, shape index: {}]   ;;  %s5204_s4 = inlined_call_operand.vmem [shape: f32[14,28], index: 4, kind: input, shape index: {}]   ;;  %s5205_s5 = inlined_call_operand.vmem [shape: f32[5,84,160], index: 5, kind: input, shape index: {}]   ;;  %s5206_s6 = inlined_call_operand.vmem [shape: f32[1,160], index: 6, kind: input, shape index: {}]   ;;  %s5207_s7 = inlined_call_operand.vmem [shape: f32[160,80], index: 7, kind: input, shape index: {}]   ;;  %s5208_s8 = inlined_call_operand.vmem [shape: f32[5,10], index: 8, kind: input, shape index: {}]   ;;  %s5209_s9 = inlined_call_operand.vmem [shape: f32[5,80,120], index: 9, kind: input, shape index: {}]   ;;  %s5210_s10 = inlined_call_operand.vmem [shape: f32[1,120], index: 10, kind: input, shape index: {}]   ;;  %s5211_s11 = inlined_call_operand.vmem [shape: f32[120,84], index: 11, kind: input, shape index: {}]   ;;  %s5212_s12 = inlined_call_operand.vmem [shape: f32[1,84], index: 12, kind: input, shape index: {}]   ;;  %s5213_s13 = inlined_call_operand.vmem [shape: f32[84,10], index: 13, kind: input, shape index: {}]   ;;  %s5214_s14 = inlined_call_operand.vmem [shape: f32[1,10], index: 14, kind: input, shape index: {}]   ;;  %s5215_s15 = inlined_call_operand.hbm [shape: f32[2,1,10], index: 15, kind: output, shape index: {}]  }
   0x1   :  { %22 = vsyncpa [#allocation3 + $0x1], 0  ;;  %s4003_s18 = smov 0   ;;  %s4005_s19 = smov 0  }
   0x2   :  { %s4007_s20 = smov 0   ;;  %s4009_s21 = smov 0  }
   0x3 LB: > { %5222 = sst [smem:[#allocation5_spill]] %s3904_s18  ;;  %s4024_s22 = sadd.s32 4294967295, %s3916_s21   ;;  %s3916_s21 = sphi %s4009_s21, %s5233_s21   ;;  %s3912_s20 = sphi %s4007_s20, %s5235_s20   ;;  %s3908_s19 = sphi %s4005_s19, %s5237_s19   ;;  %s3904_s18 = sphi %s4003_s18, %s5236_s18  }
   0x4   : > { %5223 = sst [smem:[#allocation6_spill]] %s3912_s20  ;;  %s2852_s23 = sadd.s32 4294967294, %s3916_s21  }
   0x5   : > { %5224 = sst [smem:[#allocation7_spill]] %s3916_s21  ;;  %s4028_s24 = sadd.s32 1, %s3916_s21  }
   0x6   : > { %5225 = sst [smem:[#allocation8_spill]] %s4028_s24  ;;  %s355_s25 = sadd.s32 1, %s3912_s20 }
   0x7   : > { %s352_s26 = ssub.s32 %s3916_s21, %s4028_s24  ;;  %p365_p0 = scmp.ne.s32.totalorder %s3912_s20, %s3908_s19 }
   0x8   : > { %p353_p1 = scmp.eq.s32.totalorder %s352_s26, 0  ;;  %p366_p2 = scmp.eq.s32.totalorder %s4024_s22, 1 }
   0x9   : > { %p371_p3 = scmp.ne.s32.totalorder %s3908_s19, %s3904_s18  ;;  %p372_p4 = scmp.eq.s32.totalorder %s2852_s23, 1 }
   0xa   : > { %s4039_s27 = scalar_select %p353_p1, %s3912_s20, %s355_s25  }
   0xb   : > { %p4041_p5 = por %p366_p2, %p365_p0  ;;  %p4045_p6 = por %p372_p4, %p371_p3 }
   0xc   : > { %5226 = sst [smem:[#allocation9_spill]] %s4039_s27  ;;  %p2855_p7 = scmp.ge.s32.totalorder %s3916_s21, 1 }
   0xd   : > { %s5228_s29 = scalar_select %p4045_p6, 1, 0 }
   0xe   : > { %p440_p8 = scmp.lt.s32.totalorder %s3916_s21, 3 }
   0xf   : > { %5229 = sst [smem:[#allocation10_spill]] %s5228_s29 }
  0x10   : > { %p441_p9 = pnand %p2855_p7, %p440_p8 }
  0x11   : > { %v2859_v0 = vld [vmem:[%s5201_s1 + $0x48] sm:$0xff] (!%p441_p9)  ;;  %v2861_v1 = vld [vmem:[%s5201_s1 + $0x58] sm:$0xff] (!%p441_p9)  ;;  %v2858_v2 = vld [vmem:[%s5201_s1 + $0x40] sm:$0xff] (!%p441_p9)  ;;  %p487_p10 = scmp.lt.s32.totalorder (!%p441_p9), %s4024_s22, 1  ;;  %v3918_v7 = vmov (!%p441_p9), 0.0   ;;  %v3919_v14 = vmov (!%p441_p9), 0.0|0.0  }
  0x12   : > { %444 = sbr.rel (%p441_p9) target bundleno = 2636 (0xa4c), region = 80  ;;  %v3378_v3 = vpack.c.bf16 (!%p441_p9), %v2861_v1, %v2859_v0  ;;  %v2860_v4 = vld [vmem:[%s5201_s1 + $0x50] sm:$0xff] (!%p441_p9)  ;;  %v2863_v5 = vld [vmem:[%s5201_s1 + $0x68] sm:$0xff] (!%p441_p9)  ;;  %v2865_v6 = vld [vmem:[%s5201_s1 + $0x78] sm:$0xff] (!%p441_p9)  ;;  %598 = vmatprep.mubr.f32.mxu0 (!%p441_p9), %v3918_v7  ;;  %3418 = vmatprep.subr.bf16.mxu1 (!%p441_p9), %v3919_v14  ;;  %vm517_vm0 = vcmask (!%p441_p9), 1046528   ;;  %vm525_vm1 = vcmask (!%p441_p9), 261120  }
  0x13   : > { %v3380_v8 = vpack.c.bf16 (!%p441_p9), %v2860_v4, %v2858_v2  ;;  %v3382_v9 = vpack.c.bf16 (!%p441_p9), %v2865_v6, %v2863_v5  ;;  %v2862_v10 = vld [vmem:[%s5201_s1 + $0x60] sm:$0xff] (!%p441_p9)  ;;  %v2864_v11 = vld [vmem:[%s5201_s1 + $0x70] sm:$0xff] (!%p441_p9)  ;;  %v497_v12 = vld [vmem:[%s5201_s1 + $0x8] sm:$0xff] (!%p441_p9)  ;;  %vm973_vm2 = vcmask (!%p441_p9), 1043456   ;;  %vm729_vm3 = vcmask (!%p441_p9), 1045504   ;;  %s485_s20 = sand.u32 (!%p441_p9), 1, %s3908_s19  }
  0x14   : > { %3379 = vmatprep.subr.bf16.mxu0 (!%p441_p9), %v3378_v3  ;;  %v499_v13 = vld [vmem:[%s5201_s1 + $0x18] sm:$0xff] (!%p441_p9)  ;;  %v3384_v15 = vpack.c.bf16 (!%p441_p9), %v2864_v11, %v2862_v10  ;;  %v496_v16 = vld [vmem:[%s5201_s1] sm:$0xff] (!%p441_p9)  ;;  %v498_v18 = vld [vmem:[%s5201_s1 + $0x10] sm:$0xff] (!%p441_p9)  ;;  %vm851_vm4 = vcmask (!%p441_p9), 1044480   ;;  %vm1177_vm5 = vcmask (!%p441_p9), 326656   ;;  %vm1275_vm6 = vcmask (!%p441_p9), 228352  }
  0x15   : > { %3381 = vmatpush1.bf16.msra.mxu0 (!%p441_p9), %v3380_v8  ;;  %v3386_v17 = vpack.c.bf16 (!%p441_p9), %v499_v13, %v497_v12  ;;  %v501_v19 = vld [vmem:[%s5201_s1 + $0x28] sm:$0xff] (!%p441_p9)  ;;  %v503_v20 = vld [vmem:[%s5201_s1 + $0x38] sm:$0xff] (!%p441_p9)  ;;  %v3388_v27 = vpack.c.bf16 (!%p441_p9), %v498_v18, %v496_v16  ;;  %v500_v31 = vld [vmem:[%s5201_s1 + $0x20] sm:$0xff] (!%p441_p9)  ;;  %vm3920_vm7 = vmmov (!%p441_p9), 1   ;;  %vm1410_vm9 = vcmask (!%p441_p9), 687104   ;;  %s3091_s29 = sshll.u32 (!%p441_p9), %s4024_s22, 4 }
  0x16   : > { %3383 = vmatprep.subr.bf16.mxu0 (!%p441_p9), %v3382_v9  ;;  %v3390_v30 = vpack.c.bf16 (!%p441_p9), %v503_v20, %v501_v19  ;;  %v502_v32 = vld [vmem:[%s5201_s1 + $0x30] sm:$0xff] (!%p441_p9)  ;;  %v2875_v33 = vld [vmem:[%s5201_s1 + $0x88] sm:$0xff] (!%p441_p9)  ;;  %v2877_v34 = vld [vmem:[%s5201_s1 + $0x98] sm:$0xff] (!%p441_p9)  ;;  %vm3921_vm10 = vmmov (!%p441_p9), 0   ;;  %vm2082_vm11 = vcmask (!%p441_p9), 1041408   ;;  %vm2078_vm13 = vcmask (!%p441_p9), 80896   ;;  %s5157_s18 = scalar_lea.hbm (!%p441_p9), %s5215_s15, %s3091_s29 }
  0x17   : > { %v3392_v37 = vpack.c.bf16 (!%p441_p9), %v502_v32, %v500_v31  ;;  %v3394_v38 = vpack.c.bf16 (!%p441_p9), %v2877_v34, %v2875_v33  ;;  %v1156_v40 = vld [vmem:[%s5203_s3] sm:$0xff] (!%p441_p9)  ;;  %v1157_v43 = vld [vmem:[%s5203_s3 + $0x8] sm:$0xff] (!%p441_p9)  ;;  %v1158_v44 = vld [vmem:[%s5203_s3 + $0x10] sm:$0xff] (!%p441_p9)  ;;  %vm2179_vm14 = vcmask (!%p441_p9), 654336   ;;  %vm2603_vm15 = vcmask (!%p441_p9), 982016   ;;  %s2785_s21 = scalar_lea.sflag (!%p441_p9), [#allocation3], %s485_s20 }
  0x18   : > { %v1159_v45 = vld [vmem:[%s5203_s3 + $0x18] sm:$0xff] (!%p441_p9)  ;;  %v3419_v48 = vpack.c.bf16 (!%p441_p9), %v1157_v43, %v1156_v40  ;;  %v1160_v53 = vld [vmem:[%s5203_s3 + $0x20] sm:$0xff] (!%p441_p9)  ;;  %v1161_v54 = vld [vmem:[%s5203_s3 + $0x28] sm:$0xff] (!%p441_p9) }
  0x19   : > { %s488_s27 = scalar_select %p487_p10, %s4024_s22, 1  ;;  %3385 = vmatpush1.bf16.msra.mxu0 %v3384_v15  ;;  %v3422_v52 = vpack.c.bf16 %v1159_v45, %v1158_v44  ;;  %v2874_v55 = vld [vmem:[%s5201_s1 + $0x80] sm:$0xff]  ;;  %v2876_v56 = vld [vmem:[%s5201_s1 + $0x90] sm:$0xff]  ;;  %v2879_v57 = vld [vmem:[%s5201_s1 + $0xa8] sm:$0xff]  ;;  %v3425_v59 = vpack.c.bf16 %v1161_v54, %v1160_v53 }
  0x1a   : > { %3387 = vmatprep.subr.bf16.mxu0 %v3386_v17  ;;  %3420 = vmatpush1.bf16.msra.mxu1 %v3419_v48  ;;  %v2881_v58 = vld [vmem:[%s5201_s1 + $0xb8] sm:$0xff]  ;;  %v3396_v60 = vpack.c.bf16 %v2876_v56, %v2874_v55  ;;  %v2878_v62 = vld [vmem:[%s5201_s1 + $0xa0] sm:$0xff]  ;;  %v2880_v63 = vld [vmem:[%s5201_s1 + $0xb0] sm:$0xff]  ;;  %s3922_s22 = smov [#allocation2]  }
  0x1b   : > { %s3094_s16 = sshll.u32 %s488_s27, 5  ;;  %3421 = vmatprep.subr.bf16.mxu1 %v3919_v14  ;;  %v3398_v61 = vpack.c.bf16 %v2881_v58, %v2879_v57  ;;  %v2887_v0 = vld [vmem:[%s5201_s1 + $0xc8] sm:$0xff]  ;;  %v2889_v1 = vld [vmem:[%s5201_s1 + $0xd8] sm:$0xff]  ;;  %v3400_v2 = vpack.c.bf16 %v2880_v63, %v2878_v62  ;;  %v2886_v6 = vld [vmem:[%s5201_s1 + $0xc0] sm:$0xff]  ;;  %v1088_v63 = vlaneseq  ;;  %s3858_s17 = sshll.u32 %s3922_s22, 4  ;;  %s3859_s17 = int_to_ptr.vmem [resolvable:$false] %s3858_s17 }
  0x1c   : > { %s491_s24 = scalar_lea.vmem %s5200_s0, %s3094_s16  ;;  %v3402_v3 = vpack.c.bf16 %v2889_v1, %v2887_v0  ;;  %v2888_v8 = vld [vmem:[%s5201_s1 + $0xd0] sm:$0xff]  ;;  %v2891_v9 = vld [vmem:[%s5201_s1 + $0xe8] sm:$0xff]  ;;  %v2893_v10 = vld [vmem:[%s5201_s1 + $0xf8] sm:$0xff]  ;;  %s3860_s23 = scalar_lea.vmem %s3859_s17, 32 }
  0x1d   : > { %v4100_v21 = vld [vmem:[%s491_s24] sm:$0xff]  ;;  %v4102_v22 = vld [vmem:[%s491_s24 + $0x8] sm:$0xff]  ;;  %v4104_v23 = vld [vmem:[%s491_s24 + $0x10] sm:$0xff]  ;;  %v3404_v13 = vpack.c.bf16 %v2888_v8, %v2886_v6  ;;  %v3406_v15 = vpack.c.bf16 %v2893_v10, %v2891_v9  ;;  %v4344_v0 = vshrl.u32 %v1088_v63, 7 }
  0x1e   : > { %v518_v24 = vrot.slane %v4100_v21, 1  ;;  %v519_v25 = vrot.slane %v4102_v22, 1  ;;  %v521_v26 = vrot.slane %v4104_v23, 1  ;;  %v4110_v29 = vld [vmem:[%s491_s24 + $0x18] sm:$0xff]  ;;  %v974_v39 = vrot.slane %v4100_v21, 4  ;;  %3423 = vmatpush1.bf16.msra.mxu1 %v3422_v52  ;;  %v2890_v16 = vld [vmem:[%s5201_s1 + $0xe0] sm:$0xff]  ;;  %vm3453_vm8 = vmpackc.low %vm973_vm2, %vm3920_vm7 }
  0x1f   : > { %v523_v36 = vrot.slane %v4110_v29, 1  ;;  %v975_v41 = vrot.slane %v4102_v22, 4  ;;  %v977_v42 = vrot.slane %v4104_v23, 4  ;;  %v979_v47 = vrot.slane %v4110_v29, 4  ;;  %3424 = vmatprep.subr.bf16.mxu1 %v3919_v14  ;;  %v2892_v17 = vld [vmem:[%s5201_s1 + $0xf0] sm:$0xff]  ;;  %v2899_v18 = vld [vmem:[%s5201_s1 + $0x108] sm:$0xff]  ;;  %vm3590_vm12 = vmpackc.low %vm2082_vm11, %vm3920_vm7 }
  0x20   : > { %v520_v28 = vsel %vm517_vm0, %v518_v24, %v519_v25  ;;  %v522_v35 = vsel %vm517_vm0, %v519_v25, %v521_v26  ;;  %v730_v4 = vrot.slane %v4100_v21, 2  ;;  %v731_v5 = vrot.slane %v4102_v22, 2  ;;  %v2901_v19 = vld [vmem:[%s5201_s1 + $0x118] sm:$0xff]  ;;  %v2898_v31 = vld [vmem:[%s5201_s1 + $0x100] sm:$0xff]  ;;  %v2900_v32 = vld [vmem:[%s5201_s1 + $0x110] sm:$0xff]  ;;  %s486_s24 = scalar_lea.vmem [#allocation2], %s485_s20 }
  0x21   : > { %2866 = vmatmul.mubr.msk.f32.vlgmr.msra.gmra.mrb[0].mxu0 %vm525_vm1, %v520_v28  ;;  %v524_v46 = vsel %vm517_vm0, %v521_v26, %v523_v36  ;;  %v4148_v49 = vsel %vm973_vm2, %v974_v39, %v975_v41  ;;  %v4151_v50 = vsel %vm973_vm2, %v975_v41, %v977_v42  ;;  %v4156_v51 = vsel %vm973_vm2, %v977_v42, %v979_v47  ;;  %v2903_v33 = vld [vmem:[%s5201_s1 + $0x128] sm:$0xff]  ;;  %v2905_v34 = vld [vmem:[%s5201_s1 + $0x138] sm:$0xff]  ;;  %v1162_v42 = vld [vmem:[%s5203_s3 + $0x30] sm:$0xff]  ;;  %s2797_s26 = sshll.u32 %s486_s24, 4  ;;  %s5159_s26 = int_to_ptr.vmem [resolvable:$true] %s2797_s26 }
  0x22   : > { %604 = vmatprep.mubr.f32.mxu0 %v3918_v7  ;;  %3389 = vmatpush1.bf16.msra.mxu0 %v3388_v27  ;;  %v732_v11 = vsel %vm729_vm3, %v730_v4, %v731_v5  ;;  %v733_v12 = vrot.slane %v4104_v23, 2  ;;  %v735_v24 = vrot.slane %v4110_v29, 2  ;;  %v3408_v25 = vpack.c.bf16 %v2892_v17, %v2890_v16  ;;  %v1163_v43 = vld [vmem:[%s5203_s3 + $0x38] sm:$0xff]  ;;  %v1164_v45 = vld [vmem:[%s5203_s3 + $0x40] sm:$0xff]  ;;  %v1170_v53 = vld [vmem:[%s5203_s3 + $0x70] sm:$0xff]  ;;  %s3854_s16 = scalar_lea.vmem %s5159_s26, 16  ;;  %p3861_p0 = scmp.lt.s32.totalorder %s5159_s26, %s3859_s17 }
  0x23   : > { %3391 = vmatprep.subr.bf16.mxu0 %v3390_v30  ;;  %3426 = vmatpush1.bf16.msra.mxu1 %v3425_v59  ;;  %v3410_v26 = vpack.c.bf16 %v2901_v19, %v2899_v18  ;;  %v852_v28 = vrot.slane %v4100_v21, 3  ;;  %v853_v30 = vrot.slane %v4102_v22, 3  ;;  %v857_v40 = vrot.slane %v4110_v29, 3  ;;  %v1167_v48 = vld [vmem:[%s5203_s3 + $0x58] sm:$0xff]  ;;  %v1172_v56 = vld [vmem:[%s5203_s3 + $0x80] sm:$0xff]  ;;  %v1173_v57 = vld [vmem:[%s5203_s3 + $0x88] sm:$0xff]  ;;  %p3855_p11 = scmp.ne.s32.totalorder %s5159_s26, %s3854_s16  ;;  %p3862_p1 = scmp.lt.s32.totalorder %s3860_s23, %s3854_s16 }
  0x24   : > { %3427 = vmatprep.subr.bf16.mxu1 %v3919_v14  ;;  %v734_v20 = vsel %vm729_vm3, %v731_v5, %v733_v12  ;;  %v736_v27 = vsel %vm729_vm3, %v733_v12, %v735_v24  ;;  %v3428_v44 = vpack.c.bf16 %v1163_v43, %v1162_v42  ;;  %v1171_v54 = vld [vmem:[%s5203_s3 + $0x78] sm:$0xff]  ;;  %v3443_v58 = vpack.c.bf16 %v1173_v57, %v1172_v56  ;;  %v1174_v59 = vld [vmem:[%s5203_s3 + $0x90] sm:$0xff]  ;;  %v1176_v62 = vld [vmem:[%s5203_s3 + $0xa0] sm:$0xff] }
  0x25   : > { %2867 = vmatmul.mubr.msk.f32.gmra.mrb[2].mxu0 %vm525_vm1, %v522_v35  ;;  %v3412_v35 = vpack.c.bf16 %v2900_v32, %v2898_v31  ;;  %v3440_v55 = vpack.c.bf16 %v1171_v54, %v1170_v53  ;;  %v1090_v1 = vsub.s32 0, %v4344_v0  ;;  %v1154_v56 = vld [vmem:[%s5204_s4] sm:$0xff]  ;;  %p3856_p12 = pnand %p3855_p11, %p4041_p5  ;;  %p3863_p2 = por %p3862_p1, %p3861_p0 }
  0x26   : > { %610 = vmatprep.mubr.f32.mxu0 %v3918_v7  ;;  %3393 = vmatpush1.bf16.msra.mxu0 %v3392_v37  ;;  %v2902_v37 = vld [vmem:[%s5201_s1 + $0x120] sm:$0xff] }
  0x27   : > { %3395 = vmatprep.subr.bf16.mxu0 %v3394_v38  ;;  %v2904_v38 = vld [vmem:[%s5201_s1 + $0x130] sm:$0xff]  ;;  %3429 = vmatpush1.bf16.msra.mxu1 %v3428_v44  ;;  %p3857_p13 = pneg %p3856_p12 }
  0x28   : > { %3430 = vmatprep.subr.bf16.mxu1 %v3919_v14 }
  0x29   : > { %2868 = vmatmul.mubr.msk.f32.gmra.mrb[4].mxu0 %vm525_vm1, %v524_v46  ;;  %p3864_p3 = pnand %p3863_p2, %p3857_p13 }
  0x2a   : > { %616 = vmatprep.mubr.f32.mxu0 %v3918_v7 }
  0x2d   : > { %2869 = vmatmul.mubr.msk.f32.gmra.mrb[6].mxu0 %vm525_vm1, %v523_v36  ;;  %v3414_v36 = vpack.c.bf16 %v2905_v34, %v2903_v33 }
  0x2e   : > { %695 = vmatprep.mubr.f32.mxu0 %v3918_v7 }
  0x31   : > { %2870 = vmatmul.mubr.msk.f32.vlgmr.msra.gmra.mrb[0].mxu0 %vm525_vm1, %v4100_v21  ;;  %v854_v21 = vsel %vm851_vm4, %v852_v28, %v853_v30 }
  0x32   : > { %701 = vmatprep.mubr.f32.mxu0 %v3918_v7  ;;  %3397 = vmatpush1.bf16.msra.mxu0 %v3396_v60  ;;  %v1175_v60 = vld [vmem:[%s5203_s3 + $0x98] sm:$0xff] }
  0x33   : > { %3399 = vmatprep.subr.bf16.mxu0 %v3398_v61  ;;  %v3446_v61 = vpack.c.bf16 %v1175_v60, %v1174_v59 }
  0x35   : > { %2871 = vmatmul.mubr.msk.f32.gmra.mrb[2].mxu0 %vm525_vm1, %v4102_v22  ;;  %v855_v22 = vrot.slane %v4104_v23, 3 }
  0x36   : > { %707 = vmatprep.mubr.f32.mxu0 %v3918_v7  ;;  %3401 = vmatpush1.bf16.msra.mxu0 %v3400_v2  ;;  %v1086_v2 = vld [vmem:[%s5202_s2] sm:$0x3] }
  0x37   : > { %3403 = vmatprep.subr.bf16.mxu0 %v3402_v3  ;;  %v856_v39 = vsel %vm851_vm4, %v853_v30, %v855_v22  ;;  %v858_v41 = vsel %vm851_vm4, %v855_v22, %v857_v40  ;;  %v1094_v3 = vsub.s32 1, %v4344_v0  ;;  %v1091_v4 = vrot.slane %v1086_v2, %v1090_v1 }
  0x39   : > { %2872 = vmatmul.mubr.msk.f32.gmra.mrb[4].mxu0 %vm525_vm1, %v4104_v23  ;;  %v3416_v23 = vpack.c.bf16 %v2904_v38, %v2902_v37  ;;  %v1095_v5 = vrot.slane %v1086_v2, %v1094_v3  ;;  %v2926_v2 = vld [vmem:[%s5205_s5 + $0xb8] sm:$0xff] }
  0x3a   : > { %713 = vmatprep.mubr.f32.mxu0 %v3918_v7 }
  0x3d   : > { %2873 = vmatmul.mubr.msk.f32.gmra.mrb[6].mxu0 %vm525_vm1, %v4110_v29  ;;  %v1165_v29 = vld [vmem:[%s5203_s3 + $0x48] sm:$0xff] }
  0x3e   : > { %809 = vmatprep.mubr.f32.mxu0 %v3918_v7  ;;  %v3431_v46 = vpack.c.bf16 %v1165_v29, %v1164_v45 }
  0x40   : > { %3432 = vmatpush1.bf16.msra.mxu1 %v3431_v46 }
  0x41   : > { %2882 = vmatmul.mubr.msk.f32.vlgmr.msra.gmra.mrb[0].mxu0 %vm525_vm1, %v732_v11  ;;  %3433 = vmatprep.subr.bf16.mxu1 %v3919_v14 }
  0x42   : > { %815 = vmatprep.mubr.f32.mxu0 %v3918_v7  ;;  %3405 = vmatpush1.bf16.msra.mxu0 %v3404_v13 }
  0x43   : > { %3407 = vmatprep.subr.bf16.mxu0 %v3406_v15 }
  0x45   : > { %2883 = vmatmul.mubr.msk.f32.gmra.mrb[2].mxu0 %vm525_vm1, %v734_v20 }
  0x46   : > { %821 = vmatprep.mubr.f32.mxu0 %v3918_v7  ;;  %3409 = vmatpush1.bf16.msra.mxu0 %v3408_v25 }
  0x47   : > { %3411 = vmatprep.subr.bf16.mxu0 %v3410_v26 }
  0x49   : > { %2884 = vmatmul.mubr.msk.f32.gmra.mrb[4].mxu0 %vm525_vm1, %v736_v27 }
  0x4a   : > { %827 = vmatprep.mubr.f32.mxu0 %v3918_v7 }
  0x4d   : > { %2885 = vmatmul.mubr.msk.f32.gmra.mrb[6].mxu0 %vm525_vm1, %v735_v24 }
  0x4e   : > { %931 = vmatprep.mubr.f32.mxu0 %v3918_v7 }
  0x51   : > { %2894 = vmatmul.mubr.msk.f32.vlgmr.msra.gmra.mrb[0].mxu0 %vm525_vm1, %v854_v21 }
  0x52   : > { %937 = vmatprep.mubr.f32.mxu0 %v3918_v7  ;;  %3413 = vmatpush1.bf16.msra.mxu0 %v3412_v35 }
  0x53   : > { %3415 = vmatprep.subr.bf16.mxu0 %v3414_v36 }
  0x55   : > { %2895 = vmatmul.mubr.msk.f32.gmra.mrb[2].mxu0 %vm525_vm1, %v856_v39 }
  0x56   : > { %943 = vmatprep.mubr.f32.mxu0 %v3918_v7  ;;  %3417 = vmatpush1.bf16.msra.mxu0 %v3416_v23 }
  0x57   : > { %3558 = vmatprep.subr.bf16.mxu0 %v3919_v14 }
  0x59   : > { %2896 = vmatmul.mubr.msk.f32.gmra.mrb[4].mxu0 %vm525_vm1, %v858_v41 }
  0x5a   : > { %949 = vmatprep.mubr.f32.mxu0 %v3918_v7 }
  0x5d   : > { %2897 = vmatmul.mubr.msk.f32.gmra.mrb[6].mxu0 %vm525_vm1, %v857_v40 }
  0x5e   : > { %1053 = vmatprep.mubr.f32.mxu0 %v3918_v7 }
  0x61   : > { %2906 = vmatmul.mubr.msk.f32.vlgmr.msra.gmra.mrb[0].mxu0 %vm525_vm1, %v4148_v49 }
  0x62   : > { %1059 = vmatprep.mubr.f32.mxu0 %v3918_v7 }
  0x65   : > { %2907 = vmatmul.mubr.msk.f32.gmra.mrb[2].mxu0 %vm525_vm1, %v4151_v50  ;;  %v1168_v50 = vld [vmem:[%s5203_s3 + $0x60] sm:$0xff] }
  0x66   : > { %1065 = vmatprep.mubr.f32.mxu0 %v3918_v7 }
  0x69   : > { %2908 = vmatmul.mubr.msk.f32.gmra.mrb[4].mxu0 %vm525_vm1, %v4156_v51  ;;  %v1169_v51 = vld [vmem:[%s5203_s3 + $0x68] sm:$0xff] }
  0x6a   : > { %1071 = vmatprep.mubr.f32.mxu0 %v3918_v7  ;;  %v3437_v52 = vpack.c.bf16 %v1169_v51, %v1168_v50 }
  0x6d   : > { %2909 = vmatmul.mubr.msk.f32.gmra.mrb[6].mxu0 %vm525_vm1, %v979_v47  ;;  %v1166_v47 = vld [vmem:[%s5203_s3 + $0x50] sm:$0xff] }
  0x6e   : > { %v3434_v49 = vpack.c.bf16 %v1167_v48, %v1166_v47 }
  0x70   : > { %3435 = vmatpush1.bf16.msra.mxu1 %v3434_v49 }
  0x71   : > { %3436 = vmatprep.subr.bf16.mxu1 %v3919_v14 }
  0x74   : > { %3438 = vmatpush1.bf16.msra.mxu1 %v3437_v52 }
  0x75   : > { %3439 = vmatprep.subr.bf16.mxu1 %v3919_v14 }
  0x78   : > { %3441 = vmatpush1.bf16.msra.mxu1 %v3440_v55 }
  0x79   : > { %3442 = vmatprep.subr.bf16.mxu1 %v3919_v14 }
  0x7c   : > { %3444 = vmatpush1.bf16.msra.mxu1 %v3443_v58 }
  0x7d   : > { %3445 = vmatprep.subr.bf16.mxu1 %v3919_v14 }
  0x80   : > { %3447 = vmatpush1.bf16.msra.mxu1 %v3446_v61 }
  0x81   : > { %1230 = vmatprep.subr.mxu1 %v3918_v7 }
  0x84   : > { %1231 = vmatpush1.msra.mxu1 %v1176_v62 }
 0x134   : > { %v1055_v6 = vpop.f32.mrb[0].mxu0 }
 0x135   : > { %v1098_v8 = vadd.f32 %v1091_v4, %v1055_v6  ;;  %v1057_v9 = vpop.f32.mrb[1].mxu0 }
 0x136   : > { %v1099_v10 = vadd.f32 %v1095_v5, %v1057_v9 }
 0x137   : > { %v2910_v11 = vmul.f32 -1.442695, %v1098_v8 }
 0x138   : > { %v2911_v12 = vmul.f32 -1.442695, %v1099_v10  ;;  %v1061_v13 = vpop.f32.mrb[2].mxu0  ;;  %v2925_v10 = vld [vmem:[%s5205_s5 + $0xb0] sm:$0xff] }
 0x139   : > { %3794 = vpow2.f32 %v2910_v11  ;;  %v1100_v15 = vadd.f32 %v1091_v4, %v1061_v13  ;;  %v1063_v16 = vpop.f32.mrb[3].mxu0  ;;  %v2927_v11 = vld [vmem:[%s5205_s5 + $0xc0] sm:$0xff]  ;;  %v2932_v13 = vld [vmem:[%s5205_s5 + $0xe8] sm:$0xff] }
 0x13a   : > { %3796 = vpow2.f32 %v2911_v12  ;;  %v1101_v17 = vadd.f32 %v1095_v5, %v1063_v16  ;;  %v2930_v12 = vld [vmem:[%s5205_s5 + $0xd8] sm:$0xff]  ;;  %v3460_v16 = vpack.c.bf16 %v2927_v11, %v2925_v10 }
 0x13b   : > { %v2912_v18 = vmul.f32 -1.442695, %v1100_v15  ;;  %v1155_v15 = vld [vmem:[%s5204_s4 + $0x8] sm:$0x3f]  ;;  %v1371_v10 = vld [vmem:[%s5205_s5 + $0x58] sm:$0xff] }
 0x13c   : > { %v2913_v19 = vmul.f32 -1.442695, %v1101_v17  ;;  %v1067_v20 = vpop.f32.mrb[4].mxu0  ;;  %v3462_v17 = vpack.c.bf16 %v2932_v13, %v2930_v12 }
 0x13d   : > { %3798 = vpow2.f32 %v2912_v18  ;;  %v1102_v24 = vadd.f32 %v1091_v4, %v1067_v20  ;;  %v1069_v25 = vpop.f32.mrb[5].mxu0  ;;  %v2929_v18 = vld [vmem:[%s5205_s5 + $0xd0] sm:$0xff]  ;;  %v2934_v20 = vld [vmem:[%s5205_s5 + $0xf8] sm:$0xff] }
 0x13e   : > { %3800 = vpow2.f32 %v2913_v19  ;;  %v1103_v26 = vadd.f32 %v1095_v5, %v1069_v25  ;;  %v2931_v19 = vld [vmem:[%s5205_s5 + $0xe0] sm:$0xff] }
 0x13f   : > { %v2914_v27 = vmul.f32 -1.442695, %v1102_v24  ;;  %v2936_v24 = vld [vmem:[%s5205_s5 + $0x108] sm:$0xff]  ;;  %v3464_v25 = vpack.c.bf16 %v2931_v19, %v2929_v18  ;;  %v1370_v18 = vld [vmem:[%s5205_s5 + $0x50] sm:$0xff] }
 0x140   : > { %v2915_v28 = vmul.f32 -1.442695, %v1103_v26  ;;  %v1073_v30 = vpop.f32.mrb[6].mxu0  ;;  %v3466_v26 = vpack.c.bf16 %v2936_v24, %v2934_v20  ;;  %v1373_v19 = vld [vmem:[%s5205_s5 + $0x68] sm:$0xff]  ;;  %v1375_v20 = vld [vmem:[%s5205_s5 + $0x78] sm:$0xff] }
 0x141   : > { %3802 = vpow2.f32 %v2914_v27  ;;  %v1104_v31 = vadd.f32 %v1091_v4, %v1073_v30  ;;  %v1075_v32 = vpop.f32.mrb[7].mxu0  ;;  %v2928_v4 = vld [vmem:[%s5205_s5 + $0xc8] sm:$0xff]  ;;  %v2933_v27 = vld [vmem:[%s5205_s5 + $0xf0] sm:$0xff]  ;;  %v2938_v30 = vld [vmem:[%s5205_s5 + $0x118] sm:$0xff] }
 0x142   : > { %3804 = vpow2.f32 %v2915_v28  ;;  %v1105_v33 = vadd.f32 %v1095_v5, %v1075_v32  ;;  %v3458_v9 = vpack.c.bf16 %v2928_v4, %v2926_v2  ;;  %v2935_v28 = vld [vmem:[%s5205_s5 + $0x100] sm:$0xff] }
 0x143   : > { %v3795_v34 = vpop.eup %3794  ;;  %v2916_v21 = vmul.f32 -1.442695, %v1104_v31  ;;  %v2940_v31 = vld [vmem:[%s5205_s5 + $0x128] sm:$0xff]  ;;  %v3468_v32 = vpack.c.bf16 %v2935_v28, %v2933_v27  ;;  %v1374_v27 = vld [vmem:[%s5205_s5 + $0x70] sm:$0xff] }
 0x144   : > { %v3797_v22 = vpop.eup %3796  ;;  %v1130_v35 = vadd.f32 1.0, %v3795_v34  ;;  %v2917_v36 = vmul.f32 -1.442695, %v1105_v33  ;;  %v3470_v33 = vpack.c.bf16 %v2940_v31, %v2938_v30  ;;  %v2937_v34 = vld [vmem:[%s5205_s5 + $0x110] sm:$0xff]  ;;  %v1377_v28 = vld [vmem:[%s5205_s5 + $0x88] sm:$0xff]  ;;  %v1379_v30 = vld [vmem:[%s5205_s5 + $0x98] sm:$0xff] }
 0x145   : > { %v1131_v37 = vadd.f32 1.0, %v3797_v22  ;;  %3806 = vpow2.f32 %v2916_v21  ;;  %v2939_v21 = vld [vmem:[%s5205_s5 + $0x120] sm:$0xff]  ;;  %v2942_v22 = vld [vmem:[%s5205_s5 + $0x138] sm:$0xff] }
 0x146   : > { %3808 = vrcp.f32 %v1130_v35  ;;  %v2944_v35 = vld [vmem:[%s5205_s5 + $0x148] sm:$0xff] }
 0x147   : > { %v3799_v38 = vpop.eup %3798  ;;  %3810 = vrcp.f32 %v1131_v37  ;;  %v3474_v37 = vpack.c.bf16 %v2944_v35, %v2942_v22  ;;  %v1381_v22 = vld [vmem:[%s5205_s5 + $0xa8] sm:$0xf] }
 0x148   : > { %v3801_v39 = vpop.eup %3800  ;;  %v1132_v40 = vadd.f32 1.0, %v3799_v38  ;;  %3812 = vpow2.f32 %v2917_v36  ;;  %v3472_v36 = vpack.c.bf16 %v2939_v21, %v2937_v34  ;;  %v2941_v38 = vld [vmem:[%s5205_s5 + $0x130] sm:$0xff]  ;;  %v2956_v35 = vld [vmem:[%s5205_s5 + $0x168] sm:$0xff] }
 0x149   : > { %v1133_v23 = vadd.f32 1.0, %v3801_v39  ;;  %v2943_v39 = vld [vmem:[%s5205_s5 + $0x140] sm:$0xff]  ;;  %v1378_v34 = vld [vmem:[%s5205_s5 + $0x90] sm:$0xff] }
 0x14b   : > { %v3803_v41 = vpop.eup %3802  ;;  %3814 = vrcp.f32 %v1133_v23  ;;  %v2946_v23 = vld [vmem:[%s5205_s5 + $0x158] sm:$0xf] }
 0x14c   : > { %v3805_v42 = vpop.eup %3804  ;;  %3816 = vrcp.f32 %v1132_v40  ;;  %v1134_v43 = vadd.f32 1.0, %v3803_v41  ;;  %v3476_v40 = vpack.c.bf16 %v2943_v39, %v2941_v38  ;;  %v1361_v41 = vld [vmem:[%s5205_s5 + $0x8] sm:$0xff]  ;;  %v2957_v38 = vld [vmem:[%s5205_s5 + $0x170] sm:$0xff] }
 0x14d   : > { %v1135_v44 = vadd.f32 1.0, %v3805_v42  ;;  %v1363_v42 = vld [vmem:[%s5205_s5 + $0x18] sm:$0xff]  ;;  %v2960_v39 = vld [vmem:[%s5205_s5 + $0x188] sm:$0xff] }
 0x14f   : > { %v3807_v45 = vpop.eup %3806  ;;  %3818 = vrcp.f32 %v1135_v44  ;;  %v3478_v44 = vpack.c.bf16 %v1363_v42, %v1361_v41 }
 0x150   : > { %v3809_v29 = vpop.eup %3808  ;;  %3820 = vrcp.f32 %v1134_v43  ;;  %v1136_v48 = vadd.f32 1.0, %v3807_v45  ;;  %v2945_v43 = vld [vmem:[%s5205_s5 + $0x150] sm:$0xf]  ;;  %v1977_v45 = vld [vmem:[%s5207_s7] sm:$0xff] }
 0x151   : > { %v3811_v46 = vpop.eup %3810 }
 0x152   : > { %v3813_v47 = vpop.eup %3812  ;;  %2918 = vmatprep.mubr.msk.f32.mxu1 %vm1177_vm5, %v3811_v46  ;;  %v1979_v46 = vld [vmem:[%s5207_s7 + $0x10] sm:$0xff] }
 0x153   : > { %v1137_v49 = vadd.f32 1.0, %v3813_v47  ;;  %1255 = vmatmul.mubr.f32.vlgmr.msra.gmra.mrb[0].mxu1 %v3809_v29  ;;  %v1978_v29 = vld [vmem:[%s5207_s7 + $0x8] sm:$0xff] }
 0x154   : > { %v3559_v47 = vpack.c.bf16 %v1978_v29, %v1977_v45  ;;  %v2961_v45 = vld [vmem:[%s5205_s5 + $0x190] sm:$0xff]  ;;  %v2964_v29 = vld [vmem:[%s5205_s5 + $0x1a8] sm:$0xff] }
 0x155   : > { %v3815_v50 = vpop.eup %3814  ;;  %3822 = vrcp.f32 %v1137_v49 }
 0x156   : > { %v3817_v51 = vpop.eup %3816  ;;  %3824 = vrcp.f32 %v1136_v48  ;;  %2919 = vmatprep.mubr.msk.f32.mxu1 %vm1177_vm5, %v3815_v50  ;;  %v1980_v48 = vld [vmem:[%s5207_s7 + $0x18] sm:$0xff]  ;;  %3560 = vmatpush1.bf16.msra.mxu0 %v3559_v47  ;;  %v1360_v50 = vld [vmem:[%s5205_s5] sm:$0xff] }
 0x157   : > { %1260 = vmatmul.mubr.f32.gmra.mrb[2].mxu1 %v3817_v51  ;;  %v3562_v49 = vpack.c.bf16 %v1980_v48, %v1979_v46  ;;  %3561 = vmatprep.subr.bf16.mxu0 %v3919_v14  ;;  %v1362_v51 = vld [vmem:[%s5205_s5 + $0x10] sm:$0xff]  ;;  %v2966_v46 = vld [vmem:[%s5205_s5 + $0x1b8] sm:$0xff] }
 0x158   : > { %v3506_v48 = vpack.c.bf16 %v2966_v46, %v2964_v29  ;;  %v3007_v29 = vld [vmem:[%s5205_s5 + $0x2c0] sm:$0xff]  ;;  %v3009_v46 = vld [vmem:[%s5205_s5 + $0x2d0] sm:$0xff] }
 0x159   : > { %v3819_v52 = vpop.eup %3818 }
 0x15a   : > { %v3821_v53 = vpop.eup %3820  ;;  %2920 = vmatprep.mubr.msk.f32.mxu1 %vm1177_vm5, %v3819_v52  ;;  %3563 = vmatpush1.bf16.msra.mxu0 %v3562_v49  ;;  %v2963_v49 = vld [vmem:[%s5205_s5 + $0x1a0] sm:$0xff] }
 0x15b   : > { %1265 = vmatmul.mubr.f32.gmra.mrb[4].mxu1 %v3821_v53  ;;  %3564 = vmatprep.subr.bf16.mxu0 %v3919_v14  ;;  %v3480_v53 = vpack.c.bf16 %v1362_v51, %v1360_v50  ;;  %v2965_v50 = vld [vmem:[%s5205_s5 + $0x1b0] sm:$0xff]  ;;  %v2968_v51 = vld [vmem:[%s5205_s5 + $0x1c8] sm:$0xff] }
 0x15f   : > { %v3823_v54 = vpop.eup %3822 }
 0x160   : > { %v3825_v55 = vpop.eup %3824  ;;  %2921 = vmatprep.mubr.msk.f32.mxu1 %vm1177_vm5, %v3823_v54  ;;  %v1365_v54 = vld [vmem:[%s5205_s5 + $0x28] sm:$0xff] }
 0x161   : > { %1270 = vmatmul.mubr.f32.gmra.mrb[6].mxu1 %v3825_v55  ;;  %v1367_v55 = vld [vmem:[%s5205_s5 + $0x38] sm:$0xff] }
 0x162   : > { %3195 = vmatprep.mubr.msk.f32.mxu1 %vm1275_vm6, %v1154_v56  ;;  %v3482_v4 = vpack.c.bf16 %v1367_v55, %v1365_v54  ;;  %v3508_v54 = vpack.c.bf16 %v2965_v50, %v2963_v49  ;;  %v3001_v49 = vld [vmem:[%s5205_s5 + $0x2b0] sm:$0xf] }
 0x226   : > { %v1256_v57 = vpop.f32.mrb[0].mxu1 }
 0x227   : > { %v1258_v58 = vpop.f32.mrb[1].mxu1 }
 0x22a   : > { %v1261_v59 = vpop.f32.mrb[2].mxu1 }
 0x22b   : > { %v3448_v60 = vpack.c.bf16 %v1261_v59, %v1256_v57  ;;  %v1263_v61 = vpop.f32.mrb[3].mxu1 }
 0x22d   : > { %3449 = vmatprep.subr.bf16.mxu1 %v3448_v60 }
 0x22e   : > { %v1266_v62 = vpop.f32.mrb[4].mxu1  ;;  %3451 = vmatpush3.bf16.msra.mxu1 %v3448_v60 }
 0x22f   : > { %v1268_v63 = vpop.f32.mrb[5].mxu1 }
 0x234   : > { %v1271_v5 = vpop.f32.mrb[6].mxu1 }
 0x235   : > { %v3452_v6 = vpack.c.bf16 %v1271_v5, %v1266_v62  ;;  %v1273_v8 = vpop.f32.mrb[7].mxu1  ;;  %v1364_v5 = vld [vmem:[%s5205_s5 + $0x20] sm:$0xff] }
 0x237   : > { %3454 = vmatprep.subr.msk.bf16.mxu1 %vm3453_vm8, %v3452_v6 }
 0x238   : > { %3457 = vmatpush3.bf16.msk.msra.mxu1 %vm3453_vm8, %v3452_v6  ;;  %v1366_v6 = vld [vmem:[%s5205_s5 + $0x30] sm:$0xff] }
 0x239   : > { %3459 = vmatprep.subr.bf16.mxu1 %v3458_v9  ;;  %v1369_v9 = vld [vmem:[%s5205_s5 + $0x48] sm:$0xff] }
 0x23b   : > { %3196 = vmatmul.mubr.msk.f32.vlgmr.msra.gmra.mrb[8].mxu1 %vm1275_vm6, %v1155_v15  ;;  %v3484_v15 = vpack.c.bf16 %v1366_v6, %v1364_v5  ;;  %v2973_v5 = vld [vmem:[%s5205_s5 + $0x1f0] sm:$0xff] }
 0x23c   : > { %3461 = vmatpush1.bf16.msra.mxu1 %v3460_v16  ;;  %1485 = vmatprep.mubr.f32.mxu1 %v3918_v7  ;;  %v3486_v16 = vpack.c.bf16 %v1371_v10, %v1369_v9  ;;  %v2982_v9 = vld [vmem:[%s5205_s5 + $0x218] sm:$0xff]  ;;  %v2984_v10 = vld [vmem:[%s5205_s5 + $0x228] sm:$0xff] }
 0x23d   : > { %3463 = vmatprep.subr.bf16.mxu1 %v3462_v17  ;;  %v1368_v17 = vld [vmem:[%s5205_s5 + $0x40] sm:$0xff] }
 0x23e   : > { %v3488_v24 = vpack.c.bf16 %v1370_v18, %v1368_v17  ;;  %v2986_v17 = vld [vmem:[%s5205_s5 + $0x238] sm:$0xff]  ;;  %v2988_v18 = vld [vmem:[%s5205_s5 + $0x248] sm:$0xff] }
 0x240   : > { %3465 = vmatpush1.bf16.msra.mxu1 %v3464_v25  ;;  %v3490_v25 = vpack.c.bf16 %v1375_v20, %v1373_v19  ;;  %v2975_v19 = vld [vmem:[%s5205_s5 + $0x200] sm:$0xf]  ;;  %v3518_v20 = vpack.c.bf16 %v2984_v10, %v2982_v9  ;;  %v3021_v9 = vld [vmem:[%s5205_s5 + $0x330] sm:$0xff]  ;;  %v3024_v10 = vld [vmem:[%s5205_s5 + $0x348] sm:$0xff] }
 0x241   : > { %3467 = vmatprep.subr.bf16.mxu1 %v3466_v26  ;;  %v1372_v26 = vld [vmem:[%s5205_s5 + $0x60] sm:$0xff] }
 0x242   : > { %v3492_v31 = vpack.c.bf16 %v1374_v27, %v1372_v26  ;;  %v2985_v26 = vld [vmem:[%s5205_s5 + $0x230] sm:$0xff]  ;;  %v2987_v27 = vld [vmem:[%s5205_s5 + $0x240] sm:$0xff] }
 0x244   : > { %3469 = vmatpush1.bf16.msra.mxu1 %v3468_v32  ;;  %v3494_v32 = vpack.c.bf16 %v1379_v30, %v1377_v28  ;;  %v2990_v28 = vld [vmem:[%s5205_s5 + $0x258] sm:$0xff]  ;;  %v2992_v30 = vld [vmem:[%s5205_s5 + $0x268] sm:$0xff] }
 0x245   : > { %3471 = vmatprep.subr.bf16.mxu1 %v3470_v33  ;;  %v1376_v33 = vld [vmem:[%s5205_s5 + $0x80] sm:$0xff] }
 0x246   : > { %v3496_v21 = vpack.c.bf16 %v1378_v34, %v1376_v33  ;;  %v2989_v33 = vld [vmem:[%s5205_s5 + $0x250] sm:$0xff]  ;;  %v2991_v34 = vld [vmem:[%s5205_s5 + $0x260] sm:$0xff] }
 0x248   : > { %3473 = vmatpush1.bf16.msra.mxu1 %v3472_v36  ;;  %v2958_v36 = vld [vmem:[%s5205_s5 + $0x178] sm:$0xff] }
 0x249   : > { %3475 = vmatprep.subr.bf16.mxu1 %v3474_v37  ;;  %v2955_v37 = vld [vmem:[%s5205_s5 + $0x160] sm:$0xff]  ;;  %v3498_v41 = vpack.c.bf16 %v2958_v36, %v2956_v35  ;;  %v2993_v36 = vld [vmem:[%s5205_s5 + $0x270] sm:$0xff] }
 0x24a   : > { %v3500_v42 = vpack.c.bf16 %v2957_v38, %v2955_v37  ;;  %v2995_v37 = vld [vmem:[%s5205_s5 + $0x280] sm:$0xff]  ;;  %v2998_v38 = vld [vmem:[%s5205_s5 + $0x298] sm:$0xff] }
 0x24c   : > { %3477 = vmatpush1.bf16.msra.mxu1 %v3476_v40  ;;  %v2962_v40 = vld [vmem:[%s5205_s5 + $0x198] sm:$0xff] }
 0x24d   : > { %2947 = vmatprep.subr.msk.mxu1 %vm973_vm2, %v2946_v23  ;;  %v1380_v23 = vld [vmem:[%s5205_s5 + $0xa0] sm:$0xf] }
 0x250   : > { %2948 = vmatpush1.msk.msra.mxu1 %vm973_vm2, %v2945_v43  ;;  %v3502_v43 = vpack.c.bf16 %v2962_v40, %v2960_v39  ;;  %v3532_v39 = vpack.c.bf16 %v2995_v37, %v2993_v36  ;;  %v1992_v36 = vld [vmem:[%s5207_s7 + $0x78] sm:$0xff] }
 0x251   : > { %3479 = vmatprep.subr.bf16.mxu1 %v3478_v44  ;;  %v2959_v44 = vld [vmem:[%s5205_s5 + $0x180] sm:$0xff] }
 0x252   : > { %v3504_v47 = vpack.c.bf16 %v2961_v45, %v2959_v44  ;;  %v3008_v44 = vld [vmem:[%s5205_s5 + $0x2c8] sm:$0xff]  ;;  %v3010_v45 = vld [vmem:[%s5205_s5 + $0x2d8] sm:$0xff] }
 0x253   : > { %v3538_v50 = vpack.c.bf16 %v3010_v45, %v3008_v44 }
 0x30e   : > { %v4464_v52 = vpop.f32.mrb[8].mxu1 }
 0x30f   : > { %v1408_v56 = vrot.slane %v4464_v52, 1  ;;  %v1609_v57 = vrot.slane %v4464_v52, 2  ;;  %v1726_v58 = vrot.slane %v4464_v52, 3  ;;  %v1843_v59 = vrot.slane %v4464_v52, 4  ;;  %v1351_v60 = vpop.f32.mrb[9].mxu1 }
 0x310   : > { %v1407_v61 = vrot.slane %v1351_v60, 1  ;;  %v1608_v62 = vrot.slane %v1351_v60, 2  ;;  %v1725_v63 = vrot.slane %v1351_v60, 3  ;;  %v1842_v2 = vrot.slane %v1351_v60, 4 }
 0x312   : > { %v1409_v8 = vsel %vm517_vm0, %v1407_v61, %v1408_v56  ;;  %v4492_v11 = vsel %vm729_vm3, %v1608_v62, %v1609_v57  ;;  %v4497_v12 = vsel %vm851_vm4, %v1725_v63, %v1726_v58  ;;  %v4502_v13 = vsel %vm973_vm2, %v1842_v2, %v1843_v59  ;;  %v2972_v61 = vld [vmem:[%s5205_s5 + $0x1e8] sm:$0xff]  ;;  %v2974_v62 = vld [vmem:[%s5205_s5 + $0x1f8] sm:$0xff] }
 0x313   : > { %2949 = vmatmul.mubr.msk.f32.vlgmr.msra.gmra.mrb[10].mxu1 %vm1410_vm9, %v1409_v8  ;;  %v3514_v2 = vpack.c.bf16 %v2974_v62, %v2972_v61  ;;  %v2976_v8 = vld [vmem:[%s5205_s5 + $0x208] sm:$0xf]  ;;  %vm2771_vm0 = vcmask 73728  }
 0x314   : > { %3481 = vmatpush1.bf16.msra.mxu1 %v3480_v53  ;;  %1491 = vmatprep.mubr.f32.mxu1 %v3918_v7  ;;  %v2970_v53 = vld [vmem:[%s5205_s5 + $0x1d8] sm:$0xff] }
 0x315   : > { %3483 = vmatprep.subr.bf16.mxu1 %v3482_v4  ;;  %v3510_v55 = vpack.c.bf16 %v2970_v53, %v2968_v51  ;;  %v2971_v4 = vld [vmem:[%s5205_s5 + $0x1e0] sm:$0xff]  ;;  %v3540_v51 = vpack.c.bf16 %v3009_v46, %v3007_v29 }
 0x316   : > { %v3516_v6 = vpack.c.bf16 %v2973_v5, %v2971_v4  ;;  %v3020_v4 = vld [vmem:[%s5205_s5 + $0x328] sm:$0xff] }
 0x317   : > { %2950 = vmatmul.mubr.msk.f32.gmra.mrb[12].mxu1 %vm1410_vm9, %v1408_v56  ;;  %v2967_v56 = vld [vmem:[%s5205_s5 + $0x1c0] sm:$0xff] }
 0x318   : > { %3485 = vmatpush1.bf16.msra.mxu1 %v3484_v15  ;;  %1572 = vmatprep.mubr.f32.mxu1 %v3918_v7  ;;  %v2981_v15 = vld [vmem:[%s5205_s5 + $0x210] sm:$0xff] }
 0x319   : > { %3487 = vmatprep.subr.bf16.mxu1 %v3486_v16  ;;  %v2983_v16 = vld [vmem:[%s5205_s5 + $0x220] sm:$0xff] }
 0x31c   : > { %3489 = vmatpush1.bf16.msra.mxu1 %v3488_v24  ;;  %v3520_v24 = vpack.c.bf16 %v2983_v16, %v2981_v15 }
 0x31d   : > { %3491 = vmatprep.subr.bf16.mxu1 %v3490_v25  ;;  %v3522_v25 = vpack.c.bf16 %v2988_v18, %v2986_v17  ;;  %v3023_v17 = vld [vmem:[%s5205_s5 + $0x340] sm:$0xff]  ;;  %v3025_v18 = vld [vmem:[%s5205_s5 + $0x350] sm:$0xff] }
 0x320   : > { %3493 = vmatpush1.bf16.msra.mxu1 %v3492_v31  ;;  %v3524_v31 = vpack.c.bf16 %v2987_v27, %v2985_v26  ;;  %v1982_v26 = vld [vmem:[%s5207_s7 + $0x28] sm:$0xff] }
 0x321   : > { %3495 = vmatprep.subr.bf16.mxu1 %v3494_v32  ;;  %v3526_v32 = vpack.c.bf16 %v2992_v30, %v2990_v28  ;;  %v1985_v28 = vld [vmem:[%s5207_s7 + $0x40] sm:$0xff]  ;;  %v1986_v30 = vld [vmem:[%s5207_s7 + $0x48] sm:$0xff] }
 0x324   : > { %3497 = vmatpush1.bf16.msra.mxu1 %v3496_v21  ;;  %v2994_v21 = vld [vmem:[%s5205_s5 + $0x278] sm:$0xff] }
 0x325   : > { %2951 = vmatprep.subr.msk.mxu1 %vm973_vm2, %v1381_v22  ;;  %v3528_v22 = vpack.c.bf16 %v2991_v34, %v2989_v33  ;;  %v1988_v33 = vld [vmem:[%s5207_s7 + $0x58] sm:$0xff] }
 0x328   : > { %2952 = vmatpush1.msk.msra.mxu1 %vm973_vm2, %v1380_v23  ;;  %v2997_v23 = vld [vmem:[%s5205_s5 + $0x290] sm:$0xff] }
 0x329   : > { %2953 = vmatmul.mubr.msk.f32.vlgmr.msra.gmra.mrb[10].mxu1 %vm1410_vm9, %v1351_v60  ;;  %3499 = vmatprep.subr.bf16.mxu1 %v3498_v41  ;;  %v2969_v60 = vld [vmem:[%s5205_s5 + $0x1d0] sm:$0xff]  ;;  %v2999_v41 = vld [vmem:[%s5205_s5 + $0x2a0] sm:$0xff] }
 0x32a   : > { %3501 = vmatpush1.bf16.msra.mxu1 %v3500_v42  ;;  %1578 = vmatprep.mubr.f32.mxu1 %v3918_v7  ;;  %v3512_v63 = vpack.c.bf16 %v2969_v60, %v2967_v56  ;;  %v3536_v42 = vpack.c.bf16 %v2999_v41, %v2997_v23  ;;  %v3016_v56 = vld [vmem:[%s5205_s5 + $0x308] sm:$0xff]  ;;  %v3018_v60 = vld [vmem:[%s5205_s5 + $0x318] sm:$0xff] }
 0x32b   : > { %3503 = vmatprep.subr.bf16.mxu1 %v3502_v43  ;;  %v3002_v43 = vld [vmem:[%s5205_s5 + $0x2b8] sm:$0xf]  ;;  %v3546_v62 = vpack.c.bf16 %v3018_v60, %v3016_v56 }
 0x32c   : > { %v1996_v23 = vld [vmem:[%s5207_s7 + $0x98] sm:$0xff] }
 0x32d   : > { %2954 = vmatmul.mubr.msk.f32.gmra.mrb[12].mxu1 %vm1410_vm9, %v4464_v52  ;;  %v1984_v52 = vld [vmem:[%s5207_s7 + $0x38] sm:$0xff] }
 0x32e   : > { %3505 = vmatpush1.bf16.msra.mxu1 %v3504_v47  ;;  %1685 = vmatprep.mubr.f32.mxu1 %v3918_v7  ;;  %v3012_v47 = vld [vmem:[%s5205_s5 + $0x2e8] sm:$0xff] }
 0x32f   : > { %3507 = vmatprep.subr.bf16.mxu1 %v3506_v48  ;;  %v3014_v48 = vld [vmem:[%s5205_s5 + $0x2f8] sm:$0xff] }
 0x330   : > { %v3542_v53 = vpack.c.bf16 %v3014_v48, %v3012_v47 }
 0x332   : > { %3509 = vmatpush1.bf16.msra.mxu1 %v3508_v54  ;;  %v3011_v54 = vld [vmem:[%s5205_s5 + $0x2e0] sm:$0xff] }
 0x333   : > { %3511 = vmatprep.subr.bf16.mxu1 %v3510_v55  ;;  %v3013_v55 = vld [vmem:[%s5205_s5 + $0x2f0] sm:$0xff] }
 0x334   : > { %v3544_v61 = vpack.c.bf16 %v3013_v55, %v3011_v54 }
 0x336   : > { %3513 = vmatpush1.bf16.msra.mxu1 %v3512_v63  ;;  %v3015_v63 = vld [vmem:[%s5205_s5 + $0x300] sm:$0xff] }
 0x337   : > { %3515 = vmatprep.subr.bf16.mxu1 %v3514_v2  ;;  %v3017_v2 = vld [vmem:[%s5205_s5 + $0x310] sm:$0xff] }
 0x338   : > { %v3548_v5 = vpack.c.bf16 %v3017_v2, %v3015_v63 }
 0x33a   : > { %3517 = vmatpush1.bf16.msra.mxu1 %v3516_v6 }
 0x33b   : > { %2977 = vmatprep.subr.msk.mxu1 %vm973_vm2, %v2976_v8  ;;  %v3019_v8 = vld [vmem:[%s5205_s5 + $0x320] sm:$0xff] }
 0x33c   : > { %v3552_v15 = vpack.c.bf16 %v3021_v9, %v3019_v8  ;;  %v3064_v8 = vld [vmem:[%s5209_s9 + $0xf0] sm:$0xff]  ;;  %v3065_v9 = vld [vmem:[%s5209_s9 + $0xf8] sm:$0xff] }
 0x33e   : > { %2978 = vmatpush1.msk.msra.mxu1 %vm973_vm2, %v2975_v19  ;;  %v3556_v19 = vpack.c.bf16 %v3025_v18, %v3023_v17  ;;  %v3068_v17 = vld [vmem:[%s5209_s9 + $0x110] sm:$0xff]  ;;  %v3069_v18 = vld [vmem:[%s5209_s9 + $0x118] sm:$0xff] }
 0x33f   : > { %2979 = vmatmul.mubr.msk.f32.vlgmr.msra.gmra.mrb[10].mxu1 %vm1410_vm9, %v4492_v11  ;;  %3519 = vmatprep.subr.bf16.mxu1 %v3518_v20  ;;  %v2996_v11 = vld [vmem:[%s5205_s5 + $0x288] sm:$0xff] }
 0x340   : > { %3521 = vmatpush1.bf16.msra.mxu1 %v3520_v24  ;;  %1691 = vmatprep.mubr.f32.mxu1 %v3918_v7  ;;  %v3530_v35 = vpack.c.bf16 %v2996_v11, %v2994_v21  ;;  %v3028_v20 = vld [vmem:[%s5205_s5 + $0x368] sm:$0xf]  ;;  %v3027_v24 = vld [vmem:[%s5205_s5 + $0x360] sm:$0xf] }
 0x341   : > { %3523 = vmatprep.subr.bf16.mxu1 %v3522_v25  ;;  %v1981_v25 = vld [vmem:[%s5207_s7 + $0x20] sm:$0xff]  ;;  %v1990_v11 = vld [vmem:[%s5207_s7 + $0x68] sm:$0xff] }
 0x342   : > { %v3565_v27 = vpack.c.bf16 %v1982_v26, %v1981_v25  ;;  %v1989_v21 = vld [vmem:[%s5207_s7 + $0x60] sm:$0xff]  ;;  %v3041_v26 = vld [vmem:[%s5209_s9 + $0x50] sm:$0xff] }
 0x343   : > { %2980 = vmatmul.mubr.msk.f32.gmra.mrb[12].mxu1 %vm1410_vm9, %v1609_v57  ;;  %v3000_v57 = vld [vmem:[%s5205_s5 + $0x2a8] sm:$0xff] }
 0x344   : > { %3525 = vmatpush1.bf16.msra.mxu1 %v3524_v31  ;;  %1802 = vmatprep.mubr.f32.mxu1 %v3918_v7  ;;  %v3534_v40 = vpack.c.bf16 %v3000_v57, %v2998_v38  ;;  %v3571_v31 = vpack.c.bf16 %v1986_v30, %v1985_v28  ;;  %v1993_v38 = vld [vmem:[%s5207_s7 + $0x80] sm:$0xff]  ;;  %v1994_v57 = vld [vmem:[%s5207_s7 + $0x88] sm:$0xff] }
 0x345   : > { %3527 = vmatprep.subr.bf16.mxu1 %v3526_v32  ;;  %3566 = vmatpush1.bf16.msra.mxu0 %v3565_v27  ;;  %v1987_v32 = vld [vmem:[%s5207_s7 + $0x50] sm:$0xff]  ;;  %v3042_v27 = vld [vmem:[%s5209_s9 + $0x58] sm:$0xff]  ;;  %v3043_v30 = vld [vmem:[%s5209_s9 + $0x60] sm:$0xff] }
 0x346   : > { %3567 = vmatprep.subr.bf16.mxu0 %v3919_v14  ;;  %v3574_v34 = vpack.c.bf16 %v1988_v33, %v1987_v32  ;;  %v3593_v28 = vpack.c.bf16 %v3042_v27, %v3041_v26  ;;  %v3045_v33 = vld [vmem:[%s5209_s9 + $0x70] sm:$0xff]  ;;  %v3078_v27 = vld [vmem:[%s5209_s9 + $0x158] sm:$0xff] }
 0x347   : > { %v3077_v26 = vld [vmem:[%s5209_s9 + $0x150] sm:$0xff] }
 0x348   : > { %3529 = vmatpush1.bf16.msra.mxu1 %v3528_v22  ;;  %v3577_v22 = vpack.c.bf16 %v1990_v11, %v1989_v21  ;;  %v3047_v11 = vld [vmem:[%s5209_s9 + $0x80] sm:$0xff] }
 0x349   : > { %3531 = vmatprep.subr.bf16.mxu1 %v3530_v35  ;;  %v1991_v35 = vld [vmem:[%s5207_s7 + $0x70] sm:$0xff] }
 0x34a   : > { %v3580_v37 = vpack.c.bf16 %v1992_v36, %v1991_v35  ;;  %v3049_v36 = vld [vmem:[%s5209_s9 + $0x90] sm:$0xff] }
 0x34c   : > { %3533 = vmatpush1.bf16.msra.mxu1 %v3532_v39  ;;  %v3583_v39 = vpack.c.bf16 %v1994_v57, %v1993_v38  ;;  %v3070_v57 = vld [vmem:[%s5209_s9 + $0x120] sm:$0xff] }
 0x34d   : > { %3535 = vmatprep.subr.bf16.mxu1 %v3534_v40  ;;  %v1995_v40 = vld [vmem:[%s5207_s7 + $0x90] sm:$0xff] }
 0x34e   : > { %v3586_v41 = vpack.c.bf16 %v1996_v23, %v1995_v40  ;;  %v3072_v23 = vld [vmem:[%s5209_s9 + $0x130] sm:$0xff] }
 0x350   : > { %3537 = vmatpush1.bf16.msra.mxu1 %v3536_v42  ;;  %v1936_v42 = vld [vmem:[%s5206_s6] sm:$0x3] }
 0x351   : > { %3003 = vmatprep.subr.msk.mxu1 %vm973_vm2, %v3002_v43  ;;  %v1941_v43 = vrot.slane %v1936_v42, %v1090_v1  ;;  %v1945_v44 = vrot.slane %v1936_v42, %v1094_v3 }
 0x354   : > { %3004 = vmatpush1.msk.msra.mxu1 %vm973_vm2, %v3001_v49 }
 0x355   : > { %3005 = vmatmul.mubr.msk.f32.vlgmr.msra.gmra.mrb[10].mxu1 %vm1410_vm9, %v4497_v12  ;;  %3539 = vmatprep.subr.bf16.mxu1 %v3538_v50  ;;  %v3022_v12 = vld [vmem:[%s5205_s5 + $0x338] sm:$0xff] }
 0x356   : > { %3541 = vmatpush1.bf16.msra.mxu1 %v3540_v51  ;;  %1808 = vmatprep.mubr.f32.mxu1 %v3918_v7  ;;  %v3550_v6 = vpack.c.bf16 %v3022_v12, %v3020_v4 }
 0x357   : > { %3543 = vmatprep.subr.bf16.mxu1 %v3542_v53 }
 0x359   : > { %3006 = vmatmul.mubr.msk.f32.gmra.mrb[12].mxu1 %vm1410_vm9, %v1726_v58  ;;  %v3026_v58 = vld [vmem:[%s5205_s5 + $0x358] sm:$0xff] }
 0x35a   : > { %3545 = vmatpush1.bf16.msra.mxu1 %v3544_v61  ;;  %1919 = vmatprep.mubr.f32.mxu1 %v3918_v7  ;;  %v3554_v16 = vpack.c.bf16 %v3026_v58, %v3024_v10  ;;  %v3638_v10 = vpack.c.bf16 %v3065_v9, %v3064_v8  ;;  %v3066_v58 = vld [vmem:[%s5209_s9 + $0x100] sm:$0xff]  ;;  %v3058_v8 = vld [vmem:[%s5209_s9 + $0xc8] sm:$0xff] }
 0x35b   : > { %3547 = vmatprep.subr.bf16.mxu1 %v3546_v62 }
 0x35e   : > { %3549 = vmatpush1.bf16.msra.mxu1 %v3548_v5 }
 0x35f   : > { %3551 = vmatprep.subr.bf16.mxu1 %v3550_v6 }
 0x362   : > { %3553 = vmatpush1.bf16.msra.mxu1 %v3552_v15  ;;  %v3067_v15 = vld [vmem:[%s5209_s9 + $0x108] sm:$0xff] }
 0x363   : > { %3555 = vmatprep.subr.bf16.mxu1 %v3554_v16  ;;  %v3641_v16 = vpack.c.bf16 %v3067_v15, %v3066_v58  ;;  %v3060_v58 = vld [vmem:[%s5209_s9 + $0xd8] sm:$0xff] }
 0x366   : > { %3557 = vmatpush1.bf16.msra.mxu1 %v3556_v19  ;;  %v3644_v19 = vpack.c.bf16 %v3069_v18, %v3068_v17  ;;  %v3062_v17 = vld [vmem:[%s5209_s9 + $0xe8] sm:$0xff] }
 0x367   : > { %3029 = vmatprep.subr.msk.mxu1 %vm973_vm2, %v3028_v20 }
 0x36a   : > { %3030 = vmatpush1.msk.msra.mxu1 %vm973_vm2, %v3027_v24 }
 0x36b   : > { %3031 = vmatmul.mubr.msk.f32.vlgmr.msra.gmra.mrb[10].mxu1 %vm1410_vm9, %v4502_v13  ;;  %3637 = vmatprep.subr.bf16.mxu1 %v3919_v14  ;;  %v1983_v13 = vld [vmem:[%s5207_s7 + $0x30] sm:$0xff] }
 0x36c   : > { %1925 = vmatprep.mubr.f32.mxu1 %v3918_v7  ;;  %3639 = vmatpush3.bf16.msra.mxu1 %v3638_v10  ;;  %v3059_v10 = vld [vmem:[%s5209_s9 + $0xd0] sm:$0xff] }
 0x36d   : > { %3640 = vmatprep.subr.bf16.mxu1 %v3919_v14  ;;  %v3632_v15 = vpack.c.bf16 %v3060_v58, %v3059_v10 }
 0x36f   : > { %3032 = vmatmul.mubr.msk.f32.gmra.mrb[12].mxu1 %vm1410_vm9, %v1843_v59  ;;  %v3568_v59 = vpack.c.bf16 %v1984_v52, %v1983_v13 }
 0x370   : > { %3294 = vmatprep.mubr.msk.f32.mxu1 %vm3921_vm10, %v3918_v7  ;;  %3642 = vmatpush3.bf16.msra.mxu1 %v3641_v16  ;;  %v3061_v16 = vld [vmem:[%s5209_s9 + $0xe0] sm:$0xff] }
 0x371   : > { %3569 = vmatpush1.bf16.msra.mxu0 %v3568_v59  ;;  %3643 = vmatprep.subr.bf16.mxu1 %v3919_v14  ;;  %v1976_v59 = vld [vmem:[%s5208_s8] sm:$0x1f]  ;;  %v3635_v18 = vpack.c.bf16 %v3062_v17, %v3061_v16  ;;  %v2684_v17 = vld [vmem:[%s5213_s13 + $0x8] sm:$0xff] }
 0x372   : > { %3570 = vmatprep.subr.bf16.mxu0 %v3919_v14  ;;  %v2683_v16 = vld [vmem:[%s5213_s13] sm:$0xff] }
 0x374   : > { %3645 = vmatpush3.bf16.msra.mxu1 %v3644_v19  ;;  %v3075_v19 = vld [vmem:[%s5209_s9 + $0x140] sm:$0xff] }
 0x375   : > { %3572 = vmatpush1.bf16.msra.mxu0 %v3571_v31  ;;  %3646 = vmatprep.subr.bf16.mxu1 %v3919_v14  ;;  %v3044_v31 = vld [vmem:[%s5209_s9 + $0x68] sm:$0xff] }
 0x376   : > { %3573 = vmatprep.subr.bf16.mxu0 %v3919_v14  ;;  %v3596_v32 = vpack.c.bf16 %v3044_v31, %v3043_v30  ;;  %v3081_v30 = vld [vmem:[%s5209_s9 + $0x170] sm:$0xff]  ;;  %v3082_v31 = vld [vmem:[%s5209_s9 + $0x178] sm:$0xff] }
 0x379   : > { %3575 = vmatpush1.bf16.msra.mxu0 %v3574_v34  ;;  %v3046_v34 = vld [vmem:[%s5209_s9 + $0x78] sm:$0xff] }
 0x37a   : > { %3576 = vmatprep.subr.bf16.mxu0 %v3919_v14  ;;  %v3599_v21 = vpack.c.bf16 %v3046_v34, %v3045_v33  ;;  %v3083_v33 = vld [vmem:[%s5209_s9 + $0x180] sm:$0xff]  ;;  %v3084_v34 = vld [vmem:[%s5209_s9 + $0x188] sm:$0xff] }
 0x37d   : > { %3578 = vmatpush1.bf16.msra.mxu0 %v3577_v22  ;;  %v3048_v22 = vld [vmem:[%s5209_s9 + $0x88] sm:$0xff] }
 0x37e   : > { %3579 = vmatprep.subr.bf16.mxu0 %v3919_v14  ;;  %v3602_v35 = vpack.c.bf16 %v3048_v22, %v3047_v11  ;;  %v2587_v22 = vld [vmem:[%s5211_s11] sm:$0xff] }
 0x381   : > { %3581 = vmatpush1.bf16.msra.mxu0 %v3580_v37  ;;  %v3050_v37 = vld [vmem:[%s5209_s9 + $0x98] sm:$0xff] }
 0x382   : > { %3582 = vmatprep.subr.bf16.mxu0 %v3919_v14  ;;  %v3605_v38 = vpack.c.bf16 %v3050_v37, %v3049_v36  ;;  %v2589_v37 = vld [vmem:[%s5211_s11 + $0x10] sm:$0xff] }
 0x385   : > { %3584 = vmatpush1.bf16.msra.mxu0 %v3583_v39  ;;  %v3071_v39 = vld [vmem:[%s5209_s9 + $0x128] sm:$0xff] }
 0x386   : > { %3585 = vmatprep.subr.bf16.mxu0 %v3919_v14  ;;  %v3647_v40 = vpack.c.bf16 %v3071_v39, %v3070_v57  ;;  %v2591_v39 = vld [vmem:[%s5211_s11 + $0x20] sm:$0xff] }
 0x388   : > { %3648 = vmatpush3.bf16.msra.mxu1 %v3647_v40  ;;  %v2592_v40 = vld [vmem:[%s5211_s11 + $0x28] sm:$0xff] }
 0x389   : > { %3587 = vmatpush1.bf16.msra.mxu0 %v3586_v41  ;;  %3649 = vmatprep.subr.bf16.mxu1 %v3919_v14  ;;  %v3073_v41 = vld [vmem:[%s5209_s9 + $0x138] sm:$0xff] }
 0x38a   : > { %3588 = vmatprep.subr.bf16.mxu0 %v3919_v14  ;;  %v3650_v42 = vpack.c.bf16 %v3073_v41, %v3072_v23  ;;  %v3674_v23 = vpack.c.bf16 %v2592_v40, %v2591_v39  ;;  %v2593_v41 = vld [vmem:[%s5211_s11 + $0x30] sm:$0xff] }
 0x38c   : > { %3651 = vmatpush3.bf16.msra.mxu1 %v3650_v42  ;;  %v2594_v42 = vld [vmem:[%s5211_s11 + $0x38] sm:$0xff] }
 0x38d   : > { %3667 = vmatprep.subr.bf16.mxu1 %v3919_v14 }
 0x43e   : > { %v1921_v45 = vpop.f32.mrb[10].mxu1 }
 0x43f   : > { %v1948_v29 = vadd.f32 %v1941_v43, %v1921_v45  ;;  %v1923_v46 = vpop.f32.mrb[11].mxu1 }
 0x440   : > { %v1949_v47 = vadd.f32 %v1945_v44, %v1923_v46 }
 0x441   : > { %v3033_v48 = vmul.f32 -1.442695, %v1948_v29 }
 0x442   : > { %v3034_v49 = vmul.f32 -1.442695, %v1949_v47  ;;  %v1927_v50 = vpop.f32.mrb[12].mxu1 }
 0x443   : > { %3826 = vpow2.f32 %v3033_v48  ;;  %v1950_v51 = vadd.f32 %v1941_v43, %v1927_v50  ;;  %v1929_v53 = vpop.f32.mrb[13].mxu1  ;;  %v2156_v43 = vld [vmem:[%s5209_s9] sm:$0xff]  ;;  %v2159_v50 = vld [vmem:[%s5209_s9 + $0x18] sm:$0xff] }
 0x444   : > { %3828 = vpow2.f32 %v3034_v49  ;;  %v1951_v54 = vadd.f32 %v1945_v44, %v1929_v53  ;;  %v2157_v44 = vld [vmem:[%s5209_s9 + $0x8] sm:$0xff]  ;;  %v2158_v49 = vld [vmem:[%s5209_s9 + $0x10] sm:$0xff]  ;;  %v2160_v53 = vld [vmem:[%s5209_s9 + $0x20] sm:$0xff] }
 0x445   : > { %v3035_v55 = vmul.f32 -1.442695, %v1950_v51  ;;  %v3608_v29 = vpack.c.bf16 %v2157_v44, %v2156_v43  ;;  %v3611_v51 = vpack.c.bf16 %v2159_v50, %v2158_v49  ;;  %v3677_v43 = vpack.c.bf16 %v2594_v42, %v2593_v41  ;;  %v2595_v44 = vld [vmem:[%s5211_s11 + $0x40] sm:$0xff]  ;;  %v2600_v50 = vld [vmem:[%s5211_s11 + $0x68] sm:$0xff] }
 0x446   : > { %v3036_v56 = vmul.f32 -1.442695, %v1951_v54  ;;  %v2161_v54 = vld [vmem:[%s5209_s9 + $0x28] sm:$0xff]  ;;  %v2599_v49 = vld [vmem:[%s5211_s11 + $0x60] sm:$0xff] }
 0x447   : > { %3830 = vpow2.f32 %v3035_v55  ;;  %v3614_v55 = vpack.c.bf16 %v2161_v54, %v2160_v53  ;;  %v2601_v53 = vld [vmem:[%s5211_s11 + $0x70] sm:$0xff] }
 0x448   : > { %3832 = vpow2.f32 %v3036_v56  ;;  %v2162_v56 = vld [vmem:[%s5209_s9 + $0x30] sm:$0xff] }
 0x44d   : > { %v3827_v1 = vpop.eup %3826 }
 0x44e   : > { %v3829_v60 = vpop.eup %3828  ;;  %v1964_v0 = vadd.f32 1.0, %v3827_v1  ;;  %v2163_v1 = vld [vmem:[%s5209_s9 + $0x38] sm:$0xff] }
 0x44f   : > { %v1965_v3 = vadd.f32 1.0, %v3829_v60  ;;  %v3617_v60 = vpack.c.bf16 %v2163_v1, %v2162_v56 }
 0x451   : > { %v3831_v61 = vpop.eup %3830  ;;  %3834 = vrcp.f32 %v1965_v3  ;;  %v2165_v3 = vld [vmem:[%s5209_s9 + $0x48] sm:$0xff] }
 0x452   : > { %v3833_v62 = vpop.eup %3832  ;;  %3836 = vrcp.f32 %v1964_v0  ;;  %v1966_v63 = vadd.f32 1.0, %v3831_v61  ;;  %v2164_v0 = vld [vmem:[%s5209_s9 + $0x40] sm:$0xff] }
 0x453   : > { %v1967_v2 = vadd.f32 1.0, %v3833_v62  ;;  %v3620_v61 = vpack.c.bf16 %v2165_v3, %v2164_v0  ;;  %v3053_v62 = vld [vmem:[%s5209_s9 + $0xa0] sm:$0xff] }
 0x455   : > { %3838 = vrcp.f32 %v1967_v2 }
 0x456   : > { %3840 = vrcp.f32 %v1966_v63  ;;  %v3054_v63 = vld [vmem:[%s5209_s9 + $0xa8] sm:$0xff] }
 0x457   : > { %v3623_v2 = vpack.c.bf16 %v3054_v63, %v3053_v62 }
 0x45b   : > { %v3835_v4 = vpop.eup %3834 }
 0x45c   : > { %v3837_v12 = vpop.eup %3836  ;;  %3037 = vmatprep.mubr.msk.f32.mxu0 %vm525_vm1, %v3835_v4  ;;  %v3055_v4 = vld [vmem:[%s5209_s9 + $0xb0] sm:$0xff] }
 0x45d   : > { %2068 = vmatmul.mubr.f32.vlgmr.msra.gmra.mrb[8].mxu0 %v3837_v12  ;;  %v3056_v12 = vld [vmem:[%s5209_s9 + $0xb8] sm:$0xff] }
 0x45f   : > { %v3839_v5 = vpop.eup %3838 }
 0x460   : > { %v3841_v6 = vpop.eup %3840  ;;  %3038 = vmatprep.mubr.msk.f32.mxu0 %vm525_vm1, %v3839_v5  ;;  %v3626_v5 = vpack.c.bf16 %v3056_v12, %v3055_v4  ;;  %v2579_v12 = vld [vmem:[%s5210_s10] sm:$0x1] }
 0x461   : > { %2073 = vmatmul.mubr.f32.gmra.mrb[10].mxu0 %v3841_v6  ;;  %v3057_v6 = vld [vmem:[%s5209_s9 + $0xc0] sm:$0xff] }
 0x462   : > { %3202 = vmatprep.mubr.msk.f32.mxu0 %vm3921_vm10, %v3918_v7  ;;  %v3629_v9 = vpack.c.bf16 %v3058_v8, %v3057_v6 }
 0x530   : > { %v2069_v20 = vpop.f32.mrb[8].mxu0 }
 0x531   : > { %v2071_v24 = vpop.f32.mrb[9].mxu0 }
 0x534   : > { %v2074_v25 = vpop.f32.mrb[10].mxu0 }
 0x535   : > { %v3589_v13 = vpack.c.bf16 %v2074_v25, %v2069_v20  ;;  %v2076_v52 = vpop.f32.mrb[11].mxu0  ;;  %v3076_v20 = vld [vmem:[%s5209_s9 + $0x148] sm:$0xff] }
 0x536   : > { %v3653_v24 = vpack.c.bf16 %v3076_v20, %v3075_v19  ;;  %v3079_v52 = vld [vmem:[%s5209_s9 + $0x160] sm:$0xff]  ;;  %v2685_v19 = vld [vmem:[%s5213_s13 + $0x10] sm:$0xff]  ;;  %v2686_v20 = vld [vmem:[%s5213_s13 + $0x18] sm:$0xff] }
 0x537   : > { %3591 = vmatpush3.bf16.msk.msra.mxu0 %vm3590_vm12, %v3589_v13  ;;  %v3656_v13 = vpack.c.bf16 %v3078_v27, %v3077_v26  ;;  %v2688_v26 = vld [vmem:[%s5213_s13 + $0x28] sm:$0xff] }
 0x538   : > { %3592 = vmatprep.subr.bf16.mxu0 %v3919_v14 }
 0x53a   : > { %3203 = vmatmul.mubr.msk.f32.vlgmr.msra.gmra.mrb[12].mxu0 %vm2078_vm13, %v1976_v59  ;;  %v3080_v59 = vld [vmem:[%s5209_s9 + $0x168] sm:$0xff] }
 0x53b   : > { %3594 = vmatpush3.bf16.msra.mxu0 %v3593_v28  ;;  %3225 = vmatprep.mubr.msk.f32.mxu0 %vm3921_vm10, %v3918_v7  ;;  %v3659_v28 = vpack.c.bf16 %v3080_v59, %v3079_v52  ;;  %v2690_v52 = vld [vmem:[%s5213_s13 + $0x38] sm:$0xff] }
 0x53c   : > { %3595 = vmatprep.subr.bf16.mxu0 %v3919_v14 }
 0x53f   : > { %3597 = vmatpush3.bf16.msra.mxu0 %v3596_v32  ;;  %v3662_v32 = vpack.c.bf16 %v3082_v31, %v3081_v30  ;;  %v2692_v30 = vld [vmem:[%s5213_s13 + $0x48] sm:$0xff] }
 0x540   : > { %3598 = vmatprep.subr.bf16.mxu0 %v3919_v14 }
 0x543   : > { %3600 = vmatpush3.bf16.msra.mxu0 %v3599_v21  ;;  %v3665_v21 = vpack.c.bf16 %v3084_v34, %v3083_v33  ;;  %v2602_v33 = vld [vmem:[%s5212_s12] sm:$0x1] }
 0x544   : > { %3601 = vmatprep.subr.bf16.mxu0 %v3919_v14 }
 0x547   : > { %3603 = vmatpush3.bf16.msra.mxu0 %v3602_v35  ;;  %v2588_v35 = vld [vmem:[%s5211_s11 + $0x8] sm:$0xff] }
 0x548   : > { %3604 = vmatprep.subr.bf16.mxu0 %v3919_v14  ;;  %v3668_v36 = vpack.c.bf16 %v2588_v35, %v2587_v22 }
 0x54b   : > { %3606 = vmatpush3.bf16.msra.mxu0 %v3605_v38  ;;  %v2590_v38 = vld [vmem:[%s5211_s11 + $0x18] sm:$0xff] }
 0x54c   : > { %3607 = vmatprep.subr.bf16.mxu0 %v3919_v14  ;;  %v3671_v57 = vpack.c.bf16 %v2590_v38, %v2589_v37 }
 0x60d   : > { %v4928_v45 = vpop.f32.mrb[12].mxu0 }
 0x60e   : > { %v2178_v46 = vrot.slane %v4928_v45, 1  ;;  %v2420_v47 = vrot.slane %v4928_v45, 3  ;;  %v3204_v48 = vpop.f32.mrb[13].mxu0  ;;  %v2335_v25 = vrot.slane %v4928_v45, 2  ;;  %v2505_v11 = vrot.slane %v4928_v45, 4 }
 0x610   : > { %3226 = vmatmul.mubr.msk.f32.vlgmr.msra.gmra.mrb[14].mxu0 %vm2179_vm14, %v2178_v46  ;;  %3295 = vmatmul.mubr.msk.f32.vlgmr.msra.gmra.mrb[14].mxu1 %vm2179_vm14, %v2420_v47  ;;  %v2597_v46 = vld [vmem:[%s5211_s11 + $0x50] sm:$0xff]  ;;  %v2598_v47 = vld [vmem:[%s5211_s11 + $0x58] sm:$0xff] }
 0x611   : > { %3609 = vmatpush3.bf16.msra.mxu0 %v3608_v29  ;;  %3248 = vmatprep.mubr.msk.f32.mxu0 %vm3921_vm10, %v3918_v7  ;;  %v3683_v48 = vpack.c.bf16 %v2598_v47, %v2597_v46 }
 0x612   : > { %3610 = vmatprep.subr.bf16.mxu0 %v3919_v14  ;;  %3350 = vmatprep.mubr.msk.f32.mxu1 %vm3921_vm10, %v3918_v7 }
 0x613   : > { %3669 = vmatpush3.bf16.msra.mxu1 %v3668_v36 }
 0x614   : > { %3670 = vmatprep.subr.bf16.mxu1 %v3919_v14 }
 0x615   : > { %3612 = vmatpush3.bf16.msra.mxu0 %v3611_v51  ;;  %v3686_v51 = vpack.c.bf16 %v2600_v50, %v2599_v49 }
 0x616   : > { %3613 = vmatprep.subr.bf16.mxu0 %v3919_v14 }
 0x617   : > { %3672 = vmatpush3.bf16.msra.mxu1 %v3671_v57 }
 0x618   : > { %3673 = vmatprep.subr.bf16.mxu1 %v3919_v14 }
 0x619   : > { %3615 = vmatpush3.bf16.msra.mxu0 %v3614_v55 }
 0x61a   : > { %3616 = vmatprep.subr.bf16.mxu0 %v3919_v14 }
 0x61b   : > { %3675 = vmatpush3.bf16.msra.mxu1 %v3674_v23 }
 0x61c   : > { %3676 = vmatprep.subr.bf16.mxu1 %v3919_v14 }
 0x61d   : > { %3618 = vmatpush3.bf16.msra.mxu0 %v3617_v60 }
 0x61e   : > { %3619 = vmatprep.subr.bf16.mxu0 %v3919_v14 }
 0x61f   : > { %3678 = vmatpush3.bf16.msra.mxu1 %v3677_v43 }
 0x620   : > { %3679 = vmatprep.subr.bf16.mxu1 %v3919_v14 }
 0x621   : > { %3621 = vmatpush3.bf16.msra.mxu0 %v3620_v61 }
 0x622   : > { %3622 = vmatprep.subr.bf16.mxu0 %v3919_v14 }
 0x624   : > { %3249 = vmatmul.mubr.msk.f32.vlgmr.msra.gmra.mrb[16].mxu0 %vm2179_vm14, %v4928_v45  ;;  %v2596_v45 = vld [vmem:[%s5211_s11 + $0x48] sm:$0xff] }
 0x625   : > { %3624 = vmatpush3.bf16.msra.mxu0 %v3623_v2  ;;  %3271 = vmatprep.mubr.msk.f32.mxu0 %vm3921_vm10, %v3918_v7  ;;  %v3680_v29 = vpack.c.bf16 %v2596_v45, %v2595_v44 }
 0x626   : > { %3625 = vmatprep.subr.bf16.mxu0 %v3919_v14 }
 0x627   : > { %3681 = vmatpush3.bf16.msra.mxu1 %v3680_v29 }
 0x628   : > { %3682 = vmatprep.subr.bf16.mxu1 %v3919_v14 }
 0x629   : > { %3627 = vmatpush3.bf16.msra.mxu0 %v3626_v5 }
 0x62a   : > { %3628 = vmatprep.subr.bf16.mxu0 %v3919_v14 }
 0x62b   : > { %3684 = vmatpush3.bf16.msra.mxu1 %v3683_v48 }
 0x62c   : > { %3685 = vmatprep.subr.bf16.mxu1 %v3919_v14 }
 0x62d   : > { %3630 = vmatpush3.bf16.msra.mxu0 %v3629_v9 }
 0x62e   : > { %3631 = vmatprep.subr.bf16.mxu0 %v3919_v14 }
 0x62f   : > { %3687 = vmatpush3.bf16.msra.mxu1 %v3686_v51 }
 0x630   : > { %3348 = vmatprep.subr.mxu1 %v3918_v7 }
 0x631   : > { %3633 = vmatpush3.bf16.msra.mxu0 %v3632_v15 }
 0x632   : > { %3634 = vmatprep.subr.bf16.mxu0 %v3919_v14 }
 0x633   : > { %3349 = vmatpush3.msra.mxu1 %v2601_v53 }
 0x635   : > { %3636 = vmatpush3.bf16.msra.mxu0 %v3635_v18  ;;  %v3689_v18 = vpack.c.bf16 %v2684_v17, %v2683_v16 }
 0x636   : > { %3652 = vmatprep.subr.bf16.mxu0 %v3919_v14 }
 0x638   : > { %3272 = vmatmul.mubr.msk.f32.vlgmr.msra.gmra.mrb[18].mxu0 %vm2179_vm14, %v2335_v25  ;;  %v2687_v25 = vld [vmem:[%s5213_s13 + $0x20] sm:$0xff] }
 0x639   : > { %3654 = vmatpush3.bf16.msra.mxu0 %v3653_v24  ;;  %3317 = vmatprep.mubr.msk.f32.mxu0 %vm3921_vm10, %v3918_v7  ;;  %v3692_v24 = vpack.c.bf16 %v2686_v20, %v2685_v19  ;;  %v3695_v27 = vpack.c.bf16 %v2688_v26, %v2687_v25 }
 0x63a   : > { %3655 = vmatprep.subr.bf16.mxu0 %v3919_v14 }
 0x63d   : > { %3657 = vmatpush3.bf16.msra.mxu0 %v3656_v13  ;;  %v2689_v13 = vld [vmem:[%s5213_s13 + $0x30] sm:$0xff] }
 0x63e   : > { %3658 = vmatprep.subr.bf16.mxu0 %v3919_v14  ;;  %v3698_v59 = vpack.c.bf16 %v2690_v52, %v2689_v13 }
 0x641   : > { %3660 = vmatpush3.bf16.msra.mxu0 %v3659_v28  ;;  %v2691_v28 = vld [vmem:[%s5213_s13 + $0x40] sm:$0xff] }
 0x642   : > { %3661 = vmatprep.subr.bf16.mxu0 %v3919_v14  ;;  %v3701_v31 = vpack.c.bf16 %v2692_v30, %v2691_v28 }
 0x645   : > { %3663 = vmatpush3.bf16.msra.mxu0 %v3662_v32  ;;  %v2693_v32 = vld [vmem:[%s5213_s13 + $0x50] sm:$0xf] }
 0x646   : > { %3664 = vmatprep.subr.bf16.mxu0 %v3919_v14 }
 0x649   : > { %3666 = vmatpush3.bf16.msra.mxu0 %v3665_v21 }
 0x64a   : > { %3688 = vmatprep.subr.bf16.mxu0 %v3919_v14 }
 0x64c   : > { %3318 = vmatmul.mubr.msk.f32.vlgmr.msra.gmra.mrb[20].mxu0 %vm2179_vm14, %v2505_v11 }
 0x64d   : > { %3375 = vmatprep.mubr.msk.f32.mxu0 %vm3921_vm10, %v3918_v7  ;;  %3690 = vmatpush3.bf16.msra.mxu0 %v3689_v18 }
 0x64e   : > { %3691 = vmatprep.subr.bf16.mxu0 %v3919_v14 }
 0x651   : > { %3693 = vmatpush3.bf16.msra.mxu0 %v3692_v24 }
 0x652   : > { %3694 = vmatprep.subr.bf16.mxu0 %v3919_v14 }
 0x655   : > { %3696 = vmatpush3.bf16.msra.mxu0 %v3695_v27 }
 0x656   : > { %3697 = vmatprep.subr.bf16.mxu0 %v3919_v14 }
 0x659   : > { %3699 = vmatpush3.bf16.msra.mxu0 %v3698_v59 }
 0x65a   : > { %3700 = vmatprep.subr.bf16.mxu0 %v3919_v14 }
 0x65d   : > { %3702 = vmatpush3.bf16.msra.mxu0 %v3701_v31 }
 0x65e   : > { %3373 = vmatprep.subr.mxu0 %v3918_v7  ;;  %v2694_v7 = vld [vmem:[%s5214_s14] sm:$0x1] }
 0x661   : > { %3374 = vmatpush3.msk.msra.mxu0 %vm973_vm2, %v2693_v32 }
 0x6e3   : > { %v2248_v54 = vpop.f32.mrb[14].mxu0  ;;  %v2489_v55 = vpop.f32.mrb[14].mxu1 }
 0x6e4   : > { %v3227_v56 = vpop.f32.mrb[15].mxu0  ;;  %v3296_v1 = vpop.f32.mrb[15].mxu1 }
 0x6f7   : > { %v2320_v60 = vpop.f32.mrb[16].mxu0 }
 0x6f8   : > { %v2321_v0 = vadd.f32 %v2320_v60, %v2248_v54  ;;  %v3250_v3 = vpop.f32.mrb[17].mxu0 }
 0x70b   : > { %v2404_v61 = vpop.f32.mrb[18].mxu0 }
 0x70c   : > { %v2408_v62 = vadd.f32 %v2404_v61, %v2321_v0  ;;  %v3273_v63 = vpop.f32.mrb[19].mxu0 }
 0x70e   : > { %v2493_v2 = vadd.f32 %v2489_v55, %v2408_v62 }
 0x71f   : > { %v2574_v4 = vpop.f32.mrb[20].mxu0 }
 0x720   : > { %v2578_v5 = vadd.f32 %v2574_v4, %v2493_v2  ;;  %v3319_v6 = vpop.f32.mrb[21].mxu0 }
 0x722   : > { %v2580_v8 = vadd.f32 %v2579_v12, %v2578_v5 }
 0x724   : > { %v3086_v9 = vmul.f32 -1.442695, %v2580_v8 }
 0x726   : > { %3842 = vpow2.f32 %v3086_v9 }
 0x730   : > { %v3843_v10 = vpop.eup %3842 }
 0x731   : > { %v2584_v58 = vadd.f32 1.0, %v3843_v10 }
 0x733   : > { %3844 = vrcp.f32 %v2584_v58 }
 0x73d   : > { %v3845_v15 = vpop.eup %3844 }
 0x73e   : > { %3351 = vmatmul.mubr.msk.f32.vlgmr.msra.gmra.mrb[16].mxu1 %vm2603_vm15, %v3845_v15 }
 0x811   : > { %v2673_v34 = vpop.f32.mrb[16].mxu1 }
 0x812   : > { %v2674_v21 = vadd.f32 %v2673_v34, %v2602_v33  ;;  %v3352_v11 = vpop.f32.mrb[17].mxu1 }
 0x814   : > { %v3088_v22 = vmul.f32 -1.442695, %v2674_v21 }
 0x816   : > { %3846 = vpow2.f32 %v3088_v22 }
 0x820   : > { %v3847_v35 = vpop.eup %3846 }
 0x821   : > { %v2680_v14 = vadd.f32 1.0, %v3847_v35 }
 0x823   : > { %3848 = vrcp.f32 %v2680_v14 }
 0x82d   : > { %v3849_v36 = vpop.eup %3848 }
 0x82e   : > { %3376 = vmatmul.mubr.msk.f32.vlgmr.msra.gmra.mrb[22].mxu0 %vm1410_vm9, %v3849_v36 }
 0x901   : > { %v2767_v37 = vpop.f32.mrb[22].mxu0 }
 0x902   : > { %v2768_v38 = vadd.f32 %v2767_v37, %v2694_v7  ;;  %v3377_v57 = vpop.f32.mrb[23].mxu0 }
 0x904   : > { %v2772_v39 = vsel %vm2771_vm0, %v2768_v38, -inf }
 0x905   : > { %2773 = vmax.xlane.f32.xlu0 %v2772_v39 }
 0x992   : > { %v2774_v40 = vpop.xlane.xlu0 %2773 }
 0x993   : > { %v2775_v23 = vsub.f32 %v2768_v38, %v2774_v40 }
 0x995   : > { %v2776_v41 = vmul.f32 1.442695, %v2775_v23 }
 0x997   : > { %3850 = vpow2.f32 %v2776_v41 }
 0x9a1   : > { %v3851_v42 = vpop.eup %3850 }
 0x9a2   : > { %v2778_v43 = vsel %vm2771_vm0, %v3851_v42, 0.0 }
 0x9a3   : > { %2779 = vadd.xlane.f32.xlu0 %v2778_v43 }
 0xa30   : > { %v2780_v44 = vpop.xlane.xlu0 %2779 }
 0xa31   : > { %3852 = vrcp.f32 %v2780_v44 }
 0xa3b   : > { %v3853_v45 = vpop.eup %3852 }
 0xa3c   : > { %v2782_v29 = vmul.f32 %v3853_v45, %v3851_v42 }
 0xa3e   : > { %2783 = vst.msk [vmem:[%s486_s24] sm:$0x1] %vm2771_vm0, %v2782_v29 }
 0xa3f   : > { %3867 = shalt.err (!%p3864_p3)
}
 0xa40   : > { %s3868_s25 = scalar_lea.hbm %s5157_s18, 16  ;;  %s3872_s24 = scalar_lea.hbm %s5215_s15, 32 }
 0xa41   : > { %p3869_p4 = scmp.ne.s32.totalorder %s5157_s18, %s3868_s25  ;;  %p3873_p9 = scmp.lt.u32.totalorder %s5157_s18, %s5215_s15 }
 0xa42   : > { %p3874_p10 = scmp.lt.u32.totalorder %s3872_s24, %s3868_s25  ;;  %p3876_p12 = scmp.lt.u32.totalorder %s3868_s25, %s5157_s18 }
 0xa43   : > { %p3870_p7 = pnand %p3869_p4, %p4041_p5 }
 0xa44   : > { %p3875_p11 = por %p3874_p10, %p3873_p9 }
 0xa45   : > { %p3871_p8 = pneg %p3870_p7 }
 0xa46   : > { %p3877_p13 = por %p3876_p12, %p3875_p11 }
 0xa48   : > { %p3878_p0 = pnand %p3877_p13, %p3871_p8 }
 0xa4a   : > { %3881 = shalt.err (!%p3878_p0)
}
 0xa4b   : > { %3751 = dma.vmem_to_hbm [thread:$0]  (%p4041_p5), %s5159_s26, 16, %s5157_s18, %s2785_s21  }
 0xa4c PF: > { %s5230_s16 = sld [smem:[#allocation7_spill]]  ;;  %s5231_s22 = sld [smem:[#allocation5_spill]] }
 0xa52   : > { %p3757_p1 = scmp.ge.s32.totalorder %s5230_s16, 2  ;;  %s2809_s23 = sand.u32 1, %s5231_s22  }
 0xa53   : > { %s2810_s20 = scalar_lea.sflag [#allocation3], %s2809_s23 }
 0xa54   : > { %p3754_p2 = pnand %p3757_p1, %p4045_p6 }
 0xa56   : > { %3899 = dma.done.wait (!%p3754_p2), %s2810_s20, 16  }
 0xa57   : > { %3901 = vsyncadd (!%p3754_p2), %s2810_s20, 4294967280  ;;  %s5233_s21 = sld [smem:[#allocation8_spill]]  ;;  %s5234_s25 = sld [smem:[#allocation6_spill]] }
 0xa58   : > { %s5235_s20 = sld [smem:[#allocation9_spill]]  ;;  %s5236_s18 = smov %s3908_s19 }
 0xa5d   : > { %p25_p3 = scmp.ge.s32.totalorder %s5233_s21, 4   ;;  %s5237_s19 = smov %s5234_s25 }
 0xa5f   :  { %27 = sbr.rel (!%p25_p3) target bundleno = 3 (0x3), region = 127 }
 0xa66   :  { %2814 = vsyncpa [#allocation3], 1 }
 0xa67   :  { %2816 = vsyncpa [#allocation3 + $0x1], 1 }

</bundles_post_ra>
